<compile_context>
chip_gen: v7x
topology: tpu7x:2x2x1
jax: 0.10.0
libtpu: 0.0.40
codegen_flags: <defaults>
</compile_context>

<pallas_src>
import functools
import numpy as np
import jax
import jax.numpy as jnp
from jax import lax, random
from jax.experimental import pallas as pl
from jax.experimental.pallas import tpu as pltpu

_VMEM_LIMIT = 32 * 1024 * 1024


# ----------------------------- Pallas kernels ------------------------------ #

def _sepconv_kernel(*refs, dil, apply_relu, G, oH, oW, pack, skip_mode):
    """One output D-plane per grid step.

    grouped 3x3x3 conv (per-group MXU matmul) -> pointwise 1x1x1 conv with the
    BN scale folded in -> bias -> optional fused residual (identity or 1x1x1
    conv skip with its BN folded in).
    skip_mode: 0 = plain layer, 1 = identity residual, 2 = conv-skip residual.
    """
    if skip_mode == 2:
        x_ref, xres_ref, wdw_ref, wpw_ref, wsk_ref, bias_ref, o_ref = refs
    elif skip_mode == 1:
        x_ref, xres_ref, wdw_ref, wpw_ref, bias_ref, o_ref = refs
    else:
        x_ref, wdw_ref, wpw_ref, bias_ref, o_ref = refs

    od = pl.program_id(1)

    # Load the 3 padded D-planes this output plane needs; apply the leading
    # ReLU once per plane (not per tap), then cast to bf16 for the MXU.
    planes = []
    for kd in range(3):
        p = x_ref[od + kd * dil]                       # (Hp, Wp, C) f32
        if apply_relu:
            p = jnp.maximum(p, 0.0)
        planes.append(p.astype(jnp.bfloat16))

    rows = oH * oW

    # Grouped conv: for each group of 8 channels, gather the 27 taps into a
    # [rows, 216] patch tile and contract against the true [216, 8] weights.
    dw_groups = []
    for g in range(G):
        pgrp = [p[:, :, g * 8:(g + 1) * 8] for p in planes]
        cols = []
        for kd in range(3):
            for kh in range(3):
                for kw in range(3):
                    cols.append(pgrp[kd][kh * dil:kh * dil + oH,
                                         kw * dil:kw * dil + oW, :])
        pg = jnp.concatenate(cols, axis=-1).reshape(rows, 27 * 8)   # bf16
        dw_groups.append(jnp.dot(pg, wdw_ref[g],
                                 preferred_element_type=jnp.float32))
    dw = dw_groups[0] if G == 1 else jnp.concatenate(dw_groups, axis=-1)

    # Pointwise 1x1x1 conv (BN scale pre-folded into wpw), f32 accumulate.
    res = jnp.dot(dw.astype(jnp.bfloat16), wpw_ref[...],
                  preferred_element_type=jnp.float32)               # (rows, Cout)
    res = res + bias_ref[...]

    if skip_mode == 1:
        res = res + xres_ref[...].astype(jnp.float32)
    elif skip_mode == 2:
        res = res + jnp.dot(xres_ref[...].astype(jnp.bfloat16), wsk_ref[...],
                            preferred_element_type=jnp.float32)

    Cout = res.shape[-1]
    if pack:
        # Lane-dense store: fold W into the lane dim (oW*Cout multiple of 128).
        o_ref[...] = res.reshape(oH, oW * Cout)
    else:
        o_ref[...] = res


def _skip_add_kernel(h_ref, x_ref, w_ref, b_ref, o_ref):
    """Residual fallback for stride != 1 blocks: h + (x @ w_skip) + bias."""
    s = jnp.dot(x_ref[...].astype(jnp.bfloat16), w_ref[...],
                preferred_element_type=jnp.float32)
    o_ref[...] = h_ref[...] + s + b_ref[...]


# --------------------------- layer wrappers -------------------------------- #

def _sepconv_bn_layer(x, wdw_k, wpw_k, bias_k, *, dil, apply_relu,
                      x_res=None, wskip_k=None):
    """x: (N, D, H, W, C) f32 unpadded -> (N, D, H, W, Cout) f32 (stride 1)."""
    N, D, H, W, C = x.shape
    G = C // 8
    Cout = wpw_k.shape[1]
    pad = dil                                            # module uses padding=dilation
    xp = jnp.pad(x, ((0, 0), (pad, pad), (pad, pad), (pad, pad), (0, 0)))
    Dp, Hp, Wp = D + 2 * pad, H + 2 * pad, W + 2 * pad
    oD, oH, oW = D, H, W
    rows = oH * oW

    skip_mode = 0
    mid_specs, mid_args = [], []
    if x_res is not None:
        skip_mode = 2 if wskip_k is not None else 1
        Cres = x_res.shape[-1]
        mid_specs.append(pl.BlockSpec((None, None, rows, Cres),
                                      lambda n, d: (n, d, 0, 0)))
        mid_args.append(x_res.reshape(N, oD, rows, Cres))

    w_specs = [pl.BlockSpec((G, 27 * 8, 8), lambda n, d: (0, 0, 0)),
               pl.BlockSpec((C, Cout), lambda n, d: (0, 0))]
    w_args = [wdw_k, wpw_k]
    if skip_mode == 2:
        w_specs.append(pl.BlockSpec((x_res.shape[-1], Cout), lambda n, d: (0, 0)))
        w_args.append(wskip_k)
    w_specs.append(pl.BlockSpec((1, Cout), lambda n, d: (0, 0)))
    w_args.append(bias_k.reshape(1, Cout).astype(jnp.float32))

    # Whole padded sample resident in VMEM; its block index is constant along
    # the output-D axis so Pallas fetches it once per sample and re-uses it.
    in_specs = ([pl.BlockSpec((None, Dp, Hp, Wp, C), lambda n, d: (n, 0, 0, 0, 0))]
                + mid_specs + w_specs)
    args = [xp] + mid_args + w_args

    def call(pack):
        if pack:
            out_shape = jax.ShapeDtypeStruct((N, oD, oH, oW * Cout), jnp.float32)
            out_spec = pl.BlockSpec((None, None, oH, oW * Cout),
                                    lambda n, d: (n, d, 0, 0))
        else:
            out_shape = jax.ShapeDtypeStruct((N, oD, rows, Cout), jnp.float32)
            out_spec = pl.BlockSpec((None, None, rows, Cout),
                                    lambda n, d: (n, d, 0, 0))
        return pl.pallas_call(
            functools.partial(_sepconv_kernel, dil=dil, apply_relu=apply_relu,
                              G=G, oH=oH, oW=oW, pack=pack, skip_mode=skip_mode),
            grid=(N, oD),
            in_specs=in_specs,
            out_specs=out_spec,
            out_shape=out_shape,
            compiler_params=pltpu.CompilerParams(
                dimension_semantics=("parallel", "parallel"),
                vmem_limit_bytes=_VMEM_LIMIT),
        )(*args)

    can_pack = (Cout % 128 != 0) and ((oW * Cout) % 128 == 0)
    if can_pack:
        try:
            out = call(True)
            jax.block_until_ready(out)
            return out.reshape(N, oD, oH, oW, Cout)
        except Exception:
            # TODO(synk): lane-packed store did not lower on this backend; fall
            # back to the straightforward (rows, Cout) store.
            pass
    out = call(False)
    return out.reshape(N, oD, oH, oW, Cout)


def _skip_add(h, x_s, wsk_k, bias_k):
    """Residual add with 1x1x1 conv skip (used only for stride != 1 blocks)."""
    N, oD, oH, oW, Cout = h.shape
    Cin = x_s.shape[-1]
    rows = oH * oW
    out = pl.pallas_call(
        _skip_add_kernel,
        grid=(N, oD),
        in_specs=[pl.BlockSpec((None, None, rows, Cout), lambda n, d: (n, d, 0, 0)),
                  pl.BlockSpec((None, None, rows, Cin), lambda n, d: (n, d, 0, 0)),
                  pl.BlockSpec((Cin, Cout), lambda n, d: (0, 0)),
                  pl.BlockSpec((1, Cout), lambda n, d: (0, 0))],
        out_specs=pl.BlockSpec((None, None, rows, Cout), lambda n, d: (n, d, 0, 0)),
        out_shape=jax.ShapeDtypeStruct((N, oD, rows, Cout), jnp.float32),
        compiler_params=pltpu.CompilerParams(
            dimension_semantics=("parallel", "parallel"),
            vmem_limit_bytes=_VMEM_LIMIT),
    )(h.reshape(N, oD, rows, Cout), x_s.reshape(N, oD, rows, Cin),
      wsk_k, bias_k.reshape(1, Cout).astype(jnp.float32))
    return out.reshape(N, oD, oH, oW, Cout)


# --------------------------- parameter setup -------------------------------- #

def _prep_dw_weight(w_t):
    """Torch grouped conv weight (C, 8, 3,3,3) -> (G, 27*8, 8) bf16.

    K ordering = tap-major then in-channel-within-group, matching the kernel's
    in-VMEM patch gather.
    """
    w = np.asarray(w_t, np.float32)
    C = w.shape[0]
    G = C // 8
    wf = w.reshape(C, 8, 27)                            # (co, ci_local, tap)
    out = np.zeros((G, 27 * 8, 8), np.float32)
    for g in range(G):
        for co_l in range(8):
            for ci_l in range(8):
                out[g, np.arange(27) * 8 + ci_l, co_l] = wf[g * 8 + co_l, ci_l, :]
    return jnp.asarray(out, jnp.bfloat16)


def init_voxblock_params(key, in_channels, out_channels, repeat, stride=1,
                         grow_first=True):
    assert in_channels % 8 == 0 and out_channels % 8 == 0
    if grow_first:
        channels = [out_channels] * repeat
    else:
        channels = [in_channels] * (repeat - 1) + [out_channels]
    cfgs = []
    last = in_channels
    for c in channels:
        cfgs.append((last, c, 1))
        last = c
    if stride != 1:
        cfgs.append((last, channels[-1], stride))

    eps = 1e-5
    layers = []
    for (cin, cout, s) in cfgs:
        key, k1, k2, k3, k4, k5, k6 = random.split(key, 7)
        dw = random.normal(k1, (cin, 8, 3, 3, 3), jnp.float32) / np.sqrt(8 * 27)
        pw = random.normal(k2, (cout, cin, 1, 1, 1), jnp.float32) / np.sqrt(cin)
        gamma = 1.0 + 0.1 * random.normal(k3, (cout,), jnp.float32)
        beta = 0.1 * random.normal(k4, (cout,), jnp.float32)
        rmean = 0.1 * random.normal(k5, (cout,), jnp.float32)
        rvar = 1.0 + 0.1 * jnp.abs(random.normal(k6, (cout,), jnp.float32))
        scale = gamma / jnp.sqrt(rvar + eps)
        bias = beta - rmean * scale
        wpw = jnp.transpose(pw[:, :, 0, 0, 0], (1, 0)) * scale[None, :]  # BN folded
        layers.append(dict(
            dw=dw, pw=pw, stride=s, bn_scale=scale, bn_bias=bias,
            wdw_k=_prep_dw_weight(dw),
            wpw_k=wpw.astype(jnp.bfloat16),
            bias_k=bias))

    skip = None
    if out_channels != in_channels or stride != 1:
        key, k1, k2, k3, k4, k5 = random.split(key, 6)
        w = random.normal(k1, (out_channels, in_channels, 1, 1, 1),
                          jnp.float32) / np.sqrt(in_channels)
        gamma = 1.0 + 0.1 * random.normal(k2, (out_channels,), jnp.float32)
        beta = 0.1 * random.normal(k3, (out_channels,), jnp.float32)
        rmean = 0.1 * random.normal(k4, (out_channels,), jnp.float32)
        rvar = 1.0 + 0.1 * jnp.abs(random.normal(k5, (out_channels,), jnp.float32))
        scale = gamma / jnp.sqrt(rvar + eps)
        bias = beta - rmean * scale
        wsk = jnp.transpose(w[:, :, 0, 0, 0], (1, 0)) * scale[None, :]   # BN folded
        skip = dict(w=w, bn_scale=scale, bn_bias=bias,
                    wsk_k=wsk.astype(jnp.bfloat16), bias_k=bias)

    return dict(layers=layers, skip=skip, stride=stride)


# ------------------------------- forward ------------------------------------ #

def voxblock_forward(x_ncdhw, params, *, dilation=1, start_with_relu=True):
    x = jnp.transpose(x_ncdhw, (0, 2, 3, 4, 1)).astype(jnp.float32)   # NDHWC
    stride = params['stride']
    layers = params['layers']
    skip = params['skip']
    fuse_residual = (stride == 1)
    n_layers = len(layers)

    h = x
    for i, lp in enumerate(layers):
        apply_relu = start_with_relu or i > 0
        is_last = i == n_layers - 1
        if is_last and fuse_residual:
            if skip is not None:
                h = _sepconv_bn_layer(h, lp['wdw_k'], lp['wpw_k'],
                                      lp['bias_k'] + skip['bias_k'],
                                      dil=dilation, apply_relu=apply_relu,
                                      x_res=x, wskip_k=skip['wsk_k'])
            else:
                h = _sepconv_bn_layer(h, lp['wdw_k'], lp['wpw_k'], lp['bias_k'],
                                      dil=dilation, apply_relu=apply_relu,
                                      x_res=x)
        else:
            # NOTE: the stride-2 layer appended when block stride != 1 is
            # computed at stride 1 and subsampled below (mathematically equal).
            h = _sepconv_bn_layer(h, lp['wdw_k'], lp['wpw_k'], lp['bias_k'],
                                  dil=dilation, apply_relu=apply_relu)

    if not fuse_residual:
        s = stride
        h = h[:, ::s, ::s, ::s, :]
        x_s = x[:, ::s, ::s, ::s, :]
        h = _skip_add(h, x_s, skip['wsk_k'], skip['bias_k'])

    return jnp.transpose(h, (0, 4, 1, 2, 3))                          # NCDHW


# --------------------------- pure-JAX reference ------------------------------ #

def _ref_conv(x, w_torch, stride, padding, dilation, groups):
    w = jnp.transpose(w_torch, (2, 3, 4, 1, 0))
    return lax.conv_general_dilated(
        x, w, window_strides=(stride,) * 3, padding=[(padding, padding)] * 3,
        rhs_dilation=(dilation,) * 3,
        dimension_numbers=('NDHWC', 'DHWIO', 'NDHWC'),
        feature_group_count=groups)


def ref_voxblock(x_ncdhw, params, *, dilation=1, start_with_relu=True):
    x = jnp.transpose(x_ncdhw, (0, 2, 3, 4, 1)).astype(jnp.float32)
    h = x
    for i, lp in enumerate(params['layers']):
        if start_with_relu or i > 0:
            h = jnp.maximum(h, 0.0)
        cin = lp['dw'].shape[0]
        h = _ref_conv(h, lp['dw'], lp['stride'], dilation, dilation, cin // 8)
        h = _ref_conv(h, lp['pw'], 1, 0, 1, 1)
        h = h * lp['bn_scale'] + lp['bn_bias']
    if params['skip'] is not None:
        sp = params['skip']
        s = _ref_conv(x, sp['w'], params['stride'], 0, 1, 1)
        s = s * sp['bn_scale'] + sp['bn_bias']
    else:
        s = x
    return jnp.transpose(h + s, (0, 4, 1, 2, 3))


# --------------------------------- main -------------------------------------- #

if __name__ == "__main__":
    key = random.PRNGKey(0)
    kx, kp = random.split(key)
    N, Cin, Cout, D, H, W, repeat = 2, 8, 16, 8, 8, 8, 2
    x = random.normal(kx, (N, Cin, D, H, W), jnp.float32)          # NCDHW like torch
    params = init_voxblock_params(kp, Cin, Cout, repeat, stride=1, grow_first=True)

    out = jax.block_until_ready(voxblock_forward(x, params))
    assert out.shape == (N, Cout, D, H, W), out.shape

    ref = jax.block_until_ready(ref_voxblock(x, params))
    err = float(jnp.max(jnp.abs(out - ref) / (1.0 + jnp.abs(ref))))
    if not np.isfinite(err) or err > 2.5e-2:
        raise AssertionError(f"mismatch vs reference, max rel err = {err}")

    print("KERNEL_OK")
</pallas_src>

<mosaic_0001>
module attributes {stable_mosaic.version = 11 : i64} {
  func.func @_sepconv_kernel(%arg0: i32, %arg1: i32, %arg2: memref<1x10x10x10x8xf32, #tpu.memory_space<vmem>>, %arg3: memref<1x216x8xbf16, #tpu.memory_space<vmem>>, %arg4: memref<8x16xbf16, #tpu.memory_space<vmem>>, %arg5: memref<1x16xf32, #tpu.memory_space<vmem>>, %arg6: memref<1x1x8x128xf32, #tpu.memory_space<vmem>>) attributes {dimension_semantics = [#tpu.dimension_semantics<parallel>, #tpu.dimension_semantics<parallel>], iteration_bounds = array<i64: 2, 8>, scalar_prefetch = 0 : i64, scratch_operands = 0 : i64, tpu.core_type = #tpu.core_type<tc>, window_params = [{transform_indices = @transform_0, window_bounds = array<i64: 1, 10, 10, 10, 8>}, {pipeline_mode = #tpu.pipeline_mode<synchronous>, transform_indices = @transform_1, window_bounds = array<i64: 1, 216, 8>}, {pipeline_mode = #tpu.pipeline_mode<synchronous>, transform_indices = @transform_2, window_bounds = array<i64: 8, 16>}, {pipeline_mode = #tpu.pipeline_mode<synchronous>, transform_indices = @transform_3, window_bounds = array<i64: 1, 16>}, {transform_indices = @transform_4, window_bounds = array<i64: 1, 1, 8, 128>}]} {
    %c0_i32 = arith.constant 0 : i32
    %0 = arith.addi %arg1, %c0_i32 : i32
    %c0 = arith.constant 0 : index
    %1 = arith.index_cast %0 : i32 to index
    %c0_0 = arith.constant 0 : index
    %c0_1 = arith.constant 0 : index
    %c0_2 = arith.constant 0 : index
    %2 = vector.load %arg2[%c0, %1, %c0_0, %c0_1, %c0_2] : memref<1x10x10x10x8xf32, #tpu.memory_space<vmem>>, vector<1x1x10x10x8xf32>
    %3 = vector.shape_cast %2 : vector<1x1x10x10x8xf32> to vector<10x10x8xf32>
    %cst = arith.constant 0.000000e+00 : f32
    %4 = vector.broadcast %cst : f32 to vector<10x10x8xf32>
    %5 = arith.maximumf %3, %4 : vector<10x10x8xf32>
    %6 = arith.truncf %5 : vector<10x10x8xf32> to vector<10x10x8xbf16>
    %c1_i32 = arith.constant 1 : i32
    %7 = arith.addi %arg1, %c1_i32 : i32
    %c0_3 = arith.constant 0 : index
    %8 = arith.index_cast %7 : i32 to index
    %c0_4 = arith.constant 0 : index
    %c0_5 = arith.constant 0 : index
    %c0_6 = arith.constant 0 : index
    %9 = vector.load %arg2[%c0_3, %8, %c0_4, %c0_5, %c0_6] : memref<1x10x10x10x8xf32, #tpu.memory_space<vmem>>, vector<1x1x10x10x8xf32>
    %10 = vector.shape_cast %9 : vector<1x1x10x10x8xf32> to vector<10x10x8xf32>
    %cst_7 = arith.constant 0.000000e+00 : f32
    %11 = vector.broadcast %cst_7 : f32 to vector<10x10x8xf32>
    %12 = arith.maximumf %10, %11 : vector<10x10x8xf32>
    %13 = arith.truncf %12 : vector<10x10x8xf32> to vector<10x10x8xbf16>
    %c2_i32 = arith.constant 2 : i32
    %14 = arith.addi %arg1, %c2_i32 : i32
    %c0_8 = arith.constant 0 : index
    %15 = arith.index_cast %14 : i32 to index
    %c0_9 = arith.constant 0 : index
    %c0_10 = arith.constant 0 : index
    %c0_11 = arith.constant 0 : index
    %16 = vector.load %arg2[%c0_8, %15, %c0_9, %c0_10, %c0_11] : memref<1x10x10x10x8xf32, #tpu.memory_space<vmem>>, vector<1x1x10x10x8xf32>
    %17 = vector.shape_cast %16 : vector<1x1x10x10x8xf32> to vector<10x10x8xf32>
    %cst_12 = arith.constant 0.000000e+00 : f32
    %18 = vector.broadcast %cst_12 : f32 to vector<10x10x8xf32>
    %19 = arith.maximumf %17, %18 : vector<10x10x8xf32>
    %20 = arith.truncf %19 : vector<10x10x8xf32> to vector<10x10x8xbf16>
    %21 = vector.extract_strided_slice %6 {offsets = [0, 0, 0], sizes = [8, 8, 8], strides = [1, 1, 1]} : vector<10x10x8xbf16> to vector<8x8x8xbf16>
    %22 = vector.extract_strided_slice %6 {offsets = [0, 1, 0], sizes = [8, 8, 8], strides = [1, 1, 1]} : vector<10x10x8xbf16> to vector<8x8x8xbf16>
    %23 = vector.extract_strided_slice %6 {offsets = [0, 2, 0], sizes = [8, 8, 8], strides = [1, 1, 1]} : vector<10x10x8xbf16> to vector<8x8x8xbf16>
    %24 = vector.extract_strided_slice %6 {offsets = [1, 0, 0], sizes = [8, 8, 8], strides = [1, 1, 1]} : vector<10x10x8xbf16> to vector<8x8x8xbf16>
    %25 = vector.extract_strided_slice %6 {offsets = [1, 1, 0], sizes = [8, 8, 8], strides = [1, 1, 1]} : vector<10x10x8xbf16> to vector<8x8x8xbf16>
    %26 = vector.extract_strided_slice %6 {offsets = [1, 2, 0], sizes = [8, 8, 8], strides = [1, 1, 1]} : vector<10x10x8xbf16> to vector<8x8x8xbf16>
    %27 = vector.extract_strided_slice %6 {offsets = [2, 0, 0], sizes = [8, 8, 8], strides = [1, 1, 1]} : vector<10x10x8xbf16> to vector<8x8x8xbf16>
    %28 = vector.extract_strided_slice %6 {offsets = [2, 1, 0], sizes = [8, 8, 8], strides = [1, 1, 1]} : vector<10x10x8xbf16> to vector<8x8x8xbf16>
    %29 = vector.extract_strided_slice %6 {offsets = [2, 2, 0], sizes = [8, 8, 8], strides = [1, 1, 1]} : vector<10x10x8xbf16> to vector<8x8x8xbf16>
    %30 = vector.extract_strided_slice %13 {offsets = [0, 0, 0], sizes = [8, 8, 8], strides = [1, 1, 1]} : vector<10x10x8xbf16> to vector<8x8x8xbf16>
    %31 = vector.extract_strided_slice %13 {offsets = [0, 1, 0], sizes = [8, 8, 8], strides = [1, 1, 1]} : vector<10x10x8xbf16> to vector<8x8x8xbf16>
    %32 = vector.extract_strided_slice %13 {offsets = [0, 2, 0], sizes = [8, 8, 8], strides = [1, 1, 1]} : vector<10x10x8xbf16> to vector<8x8x8xbf16>
    %33 = vector.extract_strided_slice %13 {offsets = [1, 0, 0], sizes = [8, 8, 8], strides = [1, 1, 1]} : vector<10x10x8xbf16> to vector<8x8x8xbf16>
    %34 = vector.extract_strided_slice %13 {offsets = [1, 1, 0], sizes = [8, 8, 8], strides = [1, 1, 1]} : vector<10x10x8xbf16> to vector<8x8x8xbf16>
    %35 = vector.extract_strided_slice %13 {offsets = [1, 2, 0], sizes = [8, 8, 8], strides = [1, 1, 1]} : vector<10x10x8xbf16> to vector<8x8x8xbf16>
    %36 = vector.extract_strided_slice %13 {offsets = [2, 0, 0], sizes = [8, 8, 8], strides = [1, 1, 1]} : vector<10x10x8xbf16> to vector<8x8x8xbf16>
    %37 = vector.extract_strided_slice %13 {offsets = [2, 1, 0], sizes = [8, 8, 8], strides = [1, 1, 1]} : vector<10x10x8xbf16> to vector<8x8x8xbf16>
    %38 = vector.extract_strided_slice %13 {offsets = [2, 2, 0], sizes = [8, 8, 8], strides = [1, 1, 1]} : vector<10x10x8xbf16> to vector<8x8x8xbf16>
    %39 = vector.extract_strided_slice %20 {offsets = [0, 0, 0], sizes = [8, 8, 8], strides = [1, 1, 1]} : vector<10x10x8xbf16> to vector<8x8x8xbf16>
    %40 = vector.extract_strided_slice %20 {offsets = [0, 1, 0], sizes = [8, 8, 8], strides = [1, 1, 1]} : vector<10x10x8xbf16> to vector<8x8x8xbf16>
    %41 = vector.extract_strided_slice %20 {offsets = [0, 2, 0], sizes = [8, 8, 8], strides = [1, 1, 1]} : vector<10x10x8xbf16> to vector<8x8x8xbf16>
    %42 = vector.extract_strided_slice %20 {offsets = [1, 0, 0], sizes = [8, 8, 8], strides = [1, 1, 1]} : vector<10x10x8xbf16> to vector<8x8x8xbf16>
    %43 = vector.extract_strided_slice %20 {offsets = [1, 1, 0], sizes = [8, 8, 8], strides = [1, 1, 1]} : vector<10x10x8xbf16> to vector<8x8x8xbf16>
    %44 = vector.extract_strided_slice %20 {offsets = [1, 2, 0], sizes = [8, 8, 8], strides = [1, 1, 1]} : vector<10x10x8xbf16> to vector<8x8x8xbf16>
    %45 = vector.extract_strided_slice %20 {offsets = [2, 0, 0], sizes = [8, 8, 8], strides = [1, 1, 1]} : vector<10x10x8xbf16> to vector<8x8x8xbf16>
    %46 = vector.extract_strided_slice %20 {offsets = [2, 1, 0], sizes = [8, 8, 8], strides = [1, 1, 1]} : vector<10x10x8xbf16> to vector<8x8x8xbf16>
    %47 = vector.extract_strided_slice %20 {offsets = [2, 2, 0], sizes = [8, 8, 8], strides = [1, 1, 1]} : vector<10x10x8xbf16> to vector<8x8x8xbf16>
    %48 = tpu.concatenate %21, %22, %23, %24, %25, %26, %27, %28, %29, %30, %31, %32, %33, %34, %35, %36 in 2 : vector<8x8x8xbf16>, vector<8x8x8xbf16>, vector<8x8x8xbf16>, vector<8x8x8xbf16>, vector<8x8x8xbf16>, vector<8x8x8xbf16>, vector<8x8x8xbf16>, vector<8x8x8xbf16>, vector<8x8x8xbf16>, vector<8x8x8xbf16>, vector<8x8x8xbf16>, vector<8x8x8xbf16>, vector<8x8x8xbf16>, vector<8x8x8xbf16>, vector<8x8x8xbf16>, vector<8x8x8xbf16> -> vector<8x8x128xbf16>
    %49 = tpu.concatenate %37, %38, %39, %40, %41, %42, %43, %44, %45, %46, %47 in 2 : vector<8x8x8xbf16>, vector<8x8x8xbf16>, vector<8x8x8xbf16>, vector<8x8x8xbf16>, vector<8x8x8xbf16>, vector<8x8x8xbf16>, vector<8x8x8xbf16>, vector<8x8x8xbf16>, vector<8x8x8xbf16>, vector<8x8x8xbf16>, vector<8x8x8xbf16> -> vector<8x8x88xbf16>
    %50 = tpu.concatenate %48, %49 in 2 : vector<8x8x128xbf16>, vector<8x8x88xbf16> -> vector<8x8x216xbf16>
    %51 = vector.shape_cast %50 : vector<8x8x216xbf16> to vector<64x216xbf16>
    %c0_13 = arith.constant 0 : index
    %c0_14 = arith.constant 0 : index
    %c0_15 = arith.constant 0 : index
    %52 = vector.load %arg3[%c0_13, %c0_14, %c0_15] : memref<1x216x8xbf16, #tpu.memory_space<vmem>>, vector<1x216x8xbf16>
    %53 = vector.shape_cast %52 : vector<1x216x8xbf16> to vector<216x8xbf16>
    %cst_16 = arith.constant dense<0.000000e+00> : vector<64x8xf32>
    %54 = tpu.matmul %51, %53, %cst_16 {dimension_numbers = #tpu.dot_dimension_numbers<[1], [0], [0], [1], [0, 0, 1, 1], [], []>} : vector<64x216xbf16>, vector<216x8xbf16>, vector<64x8xf32> -> vector<64x8xf32>
    %55 = arith.truncf %54 : vector<64x8xf32> to vector<64x8xbf16>
    %c0_17 = arith.constant 0 : index
    %c0_18 = arith.constant 0 : index
    %56 = vector.load %arg4[%c0_17, %c0_18] : memref<8x16xbf16, #tpu.memory_space<vmem>>, vector<8x16xbf16>
    %cst_19 = arith.constant dense<0.000000e+00> : vector<64x16xf32>
    %57 = tpu.matmul %55, %56, %cst_19 {dimension_numbers = #tpu.dot_dimension_numbers<[1], [0], [0], [1], [0, 0, 1, 1], [], []>} : vector<64x8xbf16>, vector<8x16xbf16>, vector<64x16xf32> -> vector<64x16xf32>
    %c0_20 = arith.constant 0 : index
    %c0_21 = arith.constant 0 : index
    %58 = vector.load %arg5[%c0_20, %c0_21] : memref<1x16xf32, #tpu.memory_space<vmem>>, vector<1x16xf32>
    %59 = vector.broadcast %58 : vector<1x16xf32> to vector<64x16xf32>
    %60 = arith.addf %57, %59 : vector<64x16xf32>
    %61 = vector.shape_cast %60 : vector<64x16xf32> to vector<8x128xf32>
    %c0_22 = arith.constant 0 : index
    %c0_23 = arith.constant 0 : index
    %c0_24 = arith.constant 0 : index
    %c0_25 = arith.constant 0 : index
    %62 = vector.load %arg6[%c0_22, %c0_23, %c0_24, %c0_25] : memref<1x1x8x128xf32, #tpu.memory_space<vmem>>, vector<1x1x8x128xf32>
    %63 = vector.shape_cast %62 : vector<1x1x8x128xf32> to vector<8x128xf32>
    %64 = vector.shape_cast %61 : vector<8x128xf32> to vector<1x1x8x128xf32>
    tpu.vector_store %arg6[%c0_22, %c0_23, %c0_24, %c0_25], %64 {strides = array<i32>} : memref<1x1x8x128xf32, #tpu.memory_space<vmem>>, vector<1x1x8x128xf32>,
    return
  }
  func.func @transform_0(%arg0: i32, %arg1: i32) -> (i32, i32, i32, i32, i32) {
    %c0_i32 = arith.constant 0 : i32
    %c0_i32_0 = arith.constant 0 : i32
    %c0_i32_1 = arith.constant 0 : i32
    %c0_i32_2 = arith.constant 0 : i32
    %c0_i32_3 = arith.constant 0 : i32
    return %arg0, %c0_i32, %c0_i32_0, %c0_i32_1, %c0_i32_2 : i32, i32, i32, i32, i32
  }
  func.func @transform_1(%arg0: i32, %arg1: i32) -> (i32, i32, i32) {
    %c0_i32 = arith.constant 0 : i32
    %c0_i32_0 = arith.constant 0 : i32
    %c0_i32_1 = arith.constant 0 : i32
    %c0_i32_2 = arith.constant 0 : i32
    return %c0_i32, %c0_i32_0, %c0_i32_1 : i32, i32, i32
  }
  func.func @transform_2(%arg0: i32, %arg1: i32) -> (i32, i32) {
    %c0_i32 = arith.constant 0 : i32
    %c0_i32_0 = arith.constant 0 : i32
    %c0_i32_1 = arith.constant 0 : i32
    return %c0_i32, %c0_i32_0 : i32, i32
  }
  func.func @transform_3(%arg0: i32, %arg1: i32) -> (i32, i32) {
    %c0_i32 = arith.constant 0 : i32
    %c0_i32_0 = arith.constant 0 : i32
    %c0_i32_1 = arith.constant 0 : i32
    return %c0_i32, %c0_i32_0 : i32, i32
  }
  func.func @transform_4(%arg0: i32, %arg1: i32) -> (i32, i32, i32, i32) {
    %c0_i32 = arith.constant 0 : i32
    %c0_i32_0 = arith.constant 0 : i32
    %c0_i32_1 = arith.constant 0 : i32
    return %arg0, %arg1, %c0_i32, %c0_i32_0 : i32, i32, i32, i32
  }
}

module attributes {stable_mosaic.version = 11 : i64} {
  func.func @_sepconv_kernel(%arg0: i32, %arg1: i32, %arg2: memref<1x10x10x10x8xf32, #tpu.memory_space<vmem>>, %arg3: memref<1x216x8xbf16, #tpu.memory_space<vmem>>, %arg4: memref<8x16xbf16, #tpu.memory_space<vmem>>, %arg5: memref<1x16xf32, #tpu.memory_space<vmem>>, %arg6: memref<1x1x64x16xf32, #tpu.memory_space<vmem>>) attributes {dimension_semantics = [#tpu.dimension_semantics<parallel>, #tpu.dimension_semantics<parallel>], iteration_bounds = array<i64: 2, 8>, scalar_prefetch = 0 : i64, scratch_operands = 0 : i64, tpu.core_type = #tpu.core_type<tc>, window_params = [{transform_indices = @transform_0, window_bounds = array<i64: 1, 10, 10, 10, 8>}, {pipeline_mode = #tpu.pipeline_mode<synchronous>, transform_indices = @transform_1, window_bounds = array<i64: 1, 216, 8>}, {pipeline_mode = #tpu.pipeline_mode<synchronous>, transform_indices = @transform_2, window_bounds = array<i64: 8, 16>}, {pipeline_mode = #tpu.pipeline_mode<synchronous>, transform_indices = @transform_3, window_bounds = array<i64: 1, 16>}, {transform_indices = @transform_4, window_bounds = array<i64: 1, 1, 64, 16>}]} {
    %c0_i32 = arith.constant 0 : i32
    %0 = arith.addi %arg1, %c0_i32 : i32
    %c0 = arith.constant 0 : index
    %1 = arith.index_cast %0 : i32 to index
    %c0_0 = arith.constant 0 : index
    %c0_1 = arith.constant 0 : index
    %c0_2 = arith.constant 0 : index
    %2 = vector.load %arg2[%c0, %1, %c0_0, %c0_1, %c0_2] : memref<1x10x10x10x8xf32, #tpu.memory_space<vmem>>, vector<1x1x10x10x8xf32>
    %3 = vector.shape_cast %2 : vector<1x1x10x10x8xf32> to vector<10x10x8xf32>
    %cst = arith.constant 0.000000e+00 : f32
    %4 = vector.broadcast %cst : f32 to vector<10x10x8xf32>
    %5 = arith.maximumf %3, %4 : vector<10x10x8xf32>
    %6 = arith.truncf %5 : vector<10x10x8xf32> to vector<10x10x8xbf16>
    %c1_i32 = arith.constant 1 : i32
    %7 = arith.addi %arg1, %c1_i32 : i32
    %c0_3 = arith.constant 0 : index
    %8 = arith.index_cast %7 : i32 to index
    %c0_4 = arith.constant 0 : index
    %c0_5 = arith.constant 0 : index
    %c0_6 = arith.constant 0 : index
    %9 = vector.load %arg2[%c0_3, %8, %c0_4, %c0_5, %c0_6] : memref<1x10x10x10x8xf32, #tpu.memory_space<vmem>>, vector<1x1x10x10x8xf32>
    %10 = vector.shape_cast %9 : vector<1x1x10x10x8xf32> to vector<10x10x8xf32>
    %cst_7 = arith.constant 0.000000e+00 : f32
    %11 = vector.broadcast %cst_7 : f32 to vector<10x10x8xf32>
    %12 = arith.maximumf %10, %11 : vector<10x10x8xf32>
    %13 = arith.truncf %12 : vector<10x10x8xf32> to vector<10x10x8xbf16>
    %c2_i32 = arith.constant 2 : i32
    %14 = arith.addi %arg1, %c2_i32 : i32
    %c0_8 = arith.constant 0 : index
    %15 = arith.index_cast %14 : i32 to index
    %c0_9 = arith.constant 0 : index
    %c0_10 = arith.constant 0 : index
    %c0_11 = arith.constant 0 : index
    %16 = vector.load %arg2[%c0_8, %15, %c0_9, %c0_10, %c0_11] : memref<1x10x10x10x8xf32, #tpu.memory_space<vmem>>, vector<1x1x10x10x8xf32>
    %17 = vector.shape_cast %16 : vector<1x1x10x10x8xf32> to vector<10x10x8xf32>
    %cst_12 = arith.constant 0.000000e+00 : f32
    %18 = vector.broadcast %cst_12 : f32 to vector<10x10x8xf32>
    %19 = arith.maximumf %17, %18 : vector<10x10x8xf32>
    %20 = arith.truncf %19 : vector<10x10x8xf32> to vector<10x10x8xbf16>
    %21 = vector.extract_strided_slice %6 {offsets = [0, 0, 0], sizes = [8, 8, 8], strides = [1, 1, 1]} : vector<10x10x8xbf16> to vector<8x8x8xbf16>
    %22 = vector.extract_strided_slice %6 {offsets = [0, 1, 0], sizes = [8, 8, 8], strides = [1, 1, 1]} : vector<10x10x8xbf16> to vector<8x8x8xbf16>
    %23 = vector.extract_strided_slice %6 {offsets = [0, 2, 0], sizes = [8, 8, 8], strides = [1, 1, 1]} : vector<10x10x8xbf16> to vector<8x8x8xbf16>
    %24 = vector.extract_strided_slice %6 {offsets = [1, 0, 0], sizes = [8, 8, 8], strides = [1, 1, 1]} : vector<10x10x8xbf16> to vector<8x8x8xbf16>
    %25 = vector.extract_strided_slice %6 {offsets = [1, 1, 0], sizes = [8, 8, 8], strides = [1, 1, 1]} : vector<10x10x8xbf16> to vector<8x8x8xbf16>
    %26 = vector.extract_strided_slice %6 {offsets = [1, 2, 0], sizes = [8, 8, 8], strides = [1, 1, 1]} : vector<10x10x8xbf16> to vector<8x8x8xbf16>
    %27 = vector.extract_strided_slice %6 {offsets = [2, 0, 0], sizes = [8, 8, 8], strides = [1, 1, 1]} : vector<10x10x8xbf16> to vector<8x8x8xbf16>
    %28 = vector.extract_strided_slice %6 {offsets = [2, 1, 0], sizes = [8, 8, 8], strides = [1, 1, 1]} : vector<10x10x8xbf16> to vector<8x8x8xbf16>
    %29 = vector.extract_strided_slice %6 {offsets = [2, 2, 0], sizes = [8, 8, 8], strides = [1, 1, 1]} : vector<10x10x8xbf16> to vector<8x8x8xbf16>
    %30 = vector.extract_strided_slice %13 {offsets = [0, 0, 0], sizes = [8, 8, 8], strides = [1, 1, 1]} : vector<10x10x8xbf16> to vector<8x8x8xbf16>
    %31 = vector.extract_strided_slice %13 {offsets = [0, 1, 0], sizes = [8, 8, 8], strides = [1, 1, 1]} : vector<10x10x8xbf16> to vector<8x8x8xbf16>
    %32 = vector.extract_strided_slice %13 {offsets = [0, 2, 0], sizes = [8, 8, 8], strides = [1, 1, 1]} : vector<10x10x8xbf16> to vector<8x8x8xbf16>
    %33 = vector.extract_strided_slice %13 {offsets = [1, 0, 0], sizes = [8, 8, 8], strides = [1, 1, 1]} : vector<10x10x8xbf16> to vector<8x8x8xbf16>
    %34 = vector.extract_strided_slice %13 {offsets = [1, 1, 0], sizes = [8, 8, 8], strides = [1, 1, 1]} : vector<10x10x8xbf16> to vector<8x8x8xbf16>
    %35 = vector.extract_strided_slice %13 {offsets = [1, 2, 0], sizes = [8, 8, 8], strides = [1, 1, 1]} : vector<10x10x8xbf16> to vector<8x8x8xbf16>
    %36 = vector.extract_strided_slice %13 {offsets = [2, 0, 0], sizes = [8, 8, 8], strides = [1, 1, 1]} : vector<10x10x8xbf16> to vector<8x8x8xbf16>
    %37 = vector.extract_strided_slice %13 {offsets = [2, 1, 0], sizes = [8, 8, 8], strides = [1, 1, 1]} : vector<10x10x8xbf16> to vector<8x8x8xbf16>
    %38 = vector.extract_strided_slice %13 {offsets = [2, 2, 0], sizes = [8, 8, 8], strides = [1, 1, 1]} : vector<10x10x8xbf16> to vector<8x8x8xbf16>
    %39 = vector.extract_strided_slice %20 {offsets = [0, 0, 0], sizes = [8, 8, 8], strides = [1, 1, 1]} : vector<10x10x8xbf16> to vector<8x8x8xbf16>
    %40 = vector.extract_strided_slice %20 {offsets = [0, 1, 0], sizes = [8, 8, 8], strides = [1, 1, 1]} : vector<10x10x8xbf16> to vector<8x8x8xbf16>
    %41 = vector.extract_strided_slice %20 {offsets = [0, 2, 0], sizes = [8, 8, 8], strides = [1, 1, 1]} : vector<10x10x8xbf16> to vector<8x8x8xbf16>
    %42 = vector.extract_strided_slice %20 {offsets = [1, 0, 0], sizes = [8, 8, 8], strides = [1, 1, 1]} : vector<10x10x8xbf16> to vector<8x8x8xbf16>
    %43 = vector.extract_strided_slice %20 {offsets = [1, 1, 0], sizes = [8, 8, 8], strides = [1, 1, 1]} : vector<10x10x8xbf16> to vector<8x8x8xbf16>
    %44 = vector.extract_strided_slice %20 {offsets = [1, 2, 0], sizes = [8, 8, 8], strides = [1, 1, 1]} : vector<10x10x8xbf16> to vector<8x8x8xbf16>
    %45 = vector.extract_strided_slice %20 {offsets = [2, 0, 0], sizes = [8, 8, 8], strides = [1, 1, 1]} : vector<10x10x8xbf16> to vector<8x8x8xbf16>
    %46 = vector.extract_strided_slice %20 {offsets = [2, 1, 0], sizes = [8, 8, 8], strides = [1, 1, 1]} : vector<10x10x8xbf16> to vector<8x8x8xbf16>
    %47 = vector.extract_strided_slice %20 {offsets = [2, 2, 0], sizes = [8, 8, 8], strides = [1, 1, 1]} : vector<10x10x8xbf16> to vector<8x8x8xbf16>
    %48 = tpu.concatenate %21, %22, %23, %24, %25, %26, %27, %28, %29, %30, %31, %32, %33, %34, %35, %36 in 2 : vector<8x8x8xbf16>, vector<8x8x8xbf16>, vector<8x8x8xbf16>, vector<8x8x8xbf16>, vector<8x8x8xbf16>, vector<8x8x8xbf16>, vector<8x8x8xbf16>, vector<8x8x8xbf16>, vector<8x8x8xbf16>, vector<8x8x8xbf16>, vector<8x8x8xbf16>, vector<8x8x8xbf16>, vector<8x8x8xbf16>, vector<8x8x8xbf16>, vector<8x8x8xbf16>, vector<8x8x8xbf16> -> vector<8x8x128xbf16>
    %49 = tpu.concatenate %37, %38, %39, %40, %41, %42, %43, %44, %45, %46, %47 in 2 : vector<8x8x8xbf16>, vector<8x8x8xbf16>, vector<8x8x8xbf16>, vector<8x8x8xbf16>, vector<8x8x8xbf16>, vector<8x8x8xbf16>, vector<8x8x8xbf16>, vector<8x8x8xbf16>, vector<8x8x8xbf16>, vector<8x8x8xbf16>, vector<8x8x8xbf16> -> vector<8x8x88xbf16>
    %50 = tpu.concatenate %48, %49 in 2 : vector<8x8x128xbf16>, vector<8x8x88xbf16> -> vector<8x8x216xbf16>
    %51 = vector.shape_cast %50 : vector<8x8x216xbf16> to vector<64x216xbf16>
    %c0_13 = arith.constant 0 : index
    %c0_14 = arith.constant 0 : index
    %c0_15 = arith.constant 0 : index
    %52 = vector.load %arg3[%c0_13, %c0_14, %c0_15] : memref<1x216x8xbf16, #tpu.memory_space<vmem>>, vector<1x216x8xbf16>
    %53 = vector.shape_cast %52 : vector<1x216x8xbf16> to vector<216x8xbf16>
    %cst_16 = arith.constant dense<0.000000e+00> : vector<64x8xf32>
    %54 = tpu.matmul %51, %53, %cst_16 {dimension_numbers = #tpu.dot_dimension_numbers<[1], [0], [0], [1], [0, 0, 1, 1], [], []>} : vector<64x216xbf16>, vector<216x8xbf16>, vector<64x8xf32> -> vector<64x8xf32>
    %55 = arith.truncf %54 : vector<64x8xf32> to vector<64x8xbf16>
    %c0_17 = arith.constant 0 : index
    %c0_18 = arith.constant 0 : index
    %56 = vector.load %arg4[%c0_17, %c0_18] : memref<8x16xbf16, #tpu.memory_space<vmem>>, vector<8x16xbf16>
    %cst_19 = arith.constant dense<0.000000e+00> : vector<64x16xf32>
    %57 = tpu.matmul %55, %56, %cst_19 {dimension_numbers = #tpu.dot_dimension_numbers<[1], [0], [0], [1], [0, 0, 1, 1], [], []>} : vector<64x8xbf16>, vector<8x16xbf16>, vector<64x16xf32> -> vector<64x16xf32>
    %c0_20 = arith.constant 0 : index
    %c0_21 = arith.constant 0 : index
    %58 = vector.load %arg5[%c0_20, %c0_21] : memref<1x16xf32, #tpu.memory_space<vmem>>, vector<1x16xf32>
    %59 = vector.broadcast %58 : vector<1x16xf32> to vector<64x16xf32>
    %60 = arith.addf %57, %59 : vector<64x16xf32>
    %c0_22 = arith.constant 0 : index
    %c0_23 = arith.constant 0 : index
    %c0_24 = arith.constant 0 : index
    %c0_25 = arith.constant 0 : index
    %61 = vector.load %arg6[%c0_22, %c0_23, %c0_24, %c0_25] : memref<1x1x64x16xf32, #tpu.memory_space<vmem>>, vector<1x1x64x16xf32>
    %62 = vector.shape_cast %61 : vector<1x1x64x16xf32> to vector<64x16xf32>
    %63 = vector.shape_cast %60 : vector<64x16xf32> to vector<1x1x64x16xf32>
    tpu.vector_store %arg6[%c0_22, %c0_23, %c0_24, %c0_25], %63 {strides = array<i32>} : memref<1x1x64x16xf32, #tpu.memory_space<vmem>>, vector<1x1x64x16xf32>,
    return
  }
  func.func @transform_0(%arg0: i32, %arg1: i32) -> (i32, i32, i32, i32, i32) {
    %c0_i32 = arith.constant 0 : i32
    %c0_i32_0 = arith.constant 0 : i32
    %c0_i32_1 = arith.constant 0 : i32
    %c0_i32_2 = arith.constant 0 : i32
    %c0_i32_3 = arith.constant 0 : i32
    return %arg0, %c0_i32, %c0_i32_0, %c0_i32_1, %c0_i32_2 : i32, i32, i32, i32, i32
  }
  func.func @transform_1(%arg0: i32, %arg1: i32) -> (i32, i32, i32) {
    %c0_i32 = arith.constant 0 : i32
    %c0_i32_0 = arith.constant 0 : i32
    %c0_i32_1 = arith.constant 0 : i32
    %c0_i32_2 = arith.constant 0 : i32
    return %c0_i32, %c0_i32_0, %c0_i32_1 : i32, i32, i32
  }
  func.func @transform_2(%arg0: i32, %arg1: i32) -> (i32, i32) {
    %c0_i32 = arith.constant 0 : i32
    %c0_i32_0 = arith.constant 0 : i32
    %c0_i32_1 = arith.constant 0 : i32
    return %c0_i32, %c0_i32_0 : i32, i32
  }
  func.func @transform_3(%arg0: i32, %arg1: i32) -> (i32, i32) {
    %c0_i32 = arith.constant 0 : i32
    %c0_i32_0 = arith.constant 0 : i32
    %c0_i32_1 = arith.constant 0 : i32
    return %c0_i32, %c0_i32_0 : i32, i32
  }
  func.func @transform_4(%arg0: i32, %arg1: i32) -> (i32, i32, i32, i32) {
    %c0_i32 = arith.constant 0 : i32
    %c0_i32_0 = arith.constant 0 : i32
    %c0_i32_1 = arith.constant 0 : i32
    return %arg0, %arg1, %c0_i32, %c0_i32_0 : i32, i32, i32, i32
  }
}

</mosaic_0001>

<bundles_post_ra>
// kernel: tpu_custom_call.1
= control target key start
LH: loop header
LB: loop body
LE: loop exit
PB: predicated region body
PF: predicated region fallthrough
CT: control target
= control target key end

     0   :  { %s2218_s15 = smov 0   ;;  %s2220_s16 = smov 0   ;;  %s3612_s0 = inlined_call_operand.vmem [shape: f32[2,10,10,10,8], index: 0, kind: input, shape index: {}]   ;;  %s3613_s1 = inlined_call_operand.vmem [shape: bf16[1,216,8], index: 1, kind: input, shape index: {}]   ;;  %s3614_s2 = inlined_call_operand.vmem [shape: bf16[8,16], index: 2, kind: input, shape index: {}]   ;;  %s3615_s3 = inlined_call_operand.vmem [shape: f32[1,16], index: 3, kind: input, shape index: {}]   ;;  %s3616_s4 = inlined_call_operand.vmem [shape: f32[2,8,64,16], index: 4, kind: output, shape index: {}]  }
   0x1   :  { %s2222_s17 = smov 0   ;;  %s2224_s18 = smov 0  }
   0x2   :  { %s2226_s19 = smov 0  }
   0x3 LB: > { %s23_s20 = sadd.s32 1, %s2167_s17  ;;  %s26_s21 = sadd.s32 1, %s2171_s18  ;;  %s2175_s19 = sphi %s2226_s19, %s14_s19   ;;  %s2171_s18 = sphi %s2224_s18, %s3728_s18   ;;  %s2167_s17 = sphi %s2222_s17, %s3727_s17   ;;  %s2163_s16 = sphi %s2220_s16, %s3726_s16   ;;  %s2159_s15 = sphi %s2218_s15, %s3725_s15  }
   0x4   : > { %p24_p0 = scmp.ge.s32.totalorder %s23_s20, 8  ;;  %p1944_p1 = scmp.ge.s32.totalorder %s2175_s19, 1 }
   0x5   : > { %p176_p2 = scmp.lt.s32.totalorder %s2175_s19, 17 }
   0x6   : > { %s3730_s20 = smov (%p24_p0, %s23_s20), 0  ;;  %s3732_s21 = smov (!%p24_p0, %s26_s21), %s2171_s18 }
   0x7   : > { %p177_p3 = pnand %p1944_p1, %p176_p2  ;;  %p28_p4 = scmp.ge.s32.totalorder %s3732_s21, 2 }
   0x9   : > { %s3734_s21 = smov (%p28_p4, %s3732_s21), 0  ;;  %180 = sbr.rel (%p177_p3) target bundleno = 978 (0x3d2), region = 36 }
  0x10   : > { %p206_p5 = scmp.lt.s32.totalorder %s2163_s16, 1  ;;  %s221_s22 = smul.u32 160, %s2159_s15  ;;  %vm1677_vm0 = vcmask 1043456   ;;  %vm791_vm1 = vcmask 64512   ;;  %vm808_vm2 = vcmask 130048   ;;  %vm825_vm3 = vcmask 195584  }
  0x11   : > { %s2177_s28 = smov 24   ;;  %s2178_s29 = smov 16   ;;  %vm842_vm4 = vcmask 261120   ;;  %vm859_vm5 = vcmask 326656   ;;  %vm876_vm6 = vcmask 392192   ;;  %vm893_vm7 = vcmask 457728  }
  0x12   : > { %s3736_s16 = smov (!%p206_p5, %s2163_s16), 1  ;;  %s2179_s30 = smov 8   ;;  %vm910_vm8 = vcmask 523264   ;;  %vm927_vm9 = vcmask 588800   ;;  %vm944_vm10 = vcmask 654336   ;;  %vm961_vm11 = vcmask 719872  }
  0x13   : > { %s2066_s23 = smul.u32 1600, %s3736_s16  ;;  %s2180_s5 = smov 32   ;;  %vm978_vm12 = vcmask 785408   ;;  %vm995_vm13 = vcmask 850944   ;;  %vm1012_vm14 = vcmask 916480   ;;  %vm1029_vm15 = vcmask 982016  }
  0x14   : > { %s2181_s6 = smov 40   ;;  %s2182_s7 = smov 48  }
  0x15   : > { %s210_s26 = scalar_lea.vmem %s3612_s0, %s2066_s23  ;;  %s2183_s8 = smov 56  }
  0x16   : > { %s2257_s27 = scalar_lea.vmem %s210_s26, %s221_s22  ;;  %s2184_s9 = smov 64  }
  0x17   : > { %v1971_v0 = vld [vmem:[%s2257_s27 + $0x150] sm:$0xff]  ;;  %v1972_v1 = vld [vmem:[%s2257_s27 + $0x158] sm:$0x3]  ;;  %v1969_v2 = vld [vmem:[%s2257_s27 + $0x140] sm:$0xff]  ;;  %s2185_s10 = smov 72   ;;  %s2186_s11 = smov 80  }
  0x18   : > { %v351_v3 = vmax.f32 %v1971_v0, 0.0  ;;  %v352_v4 = vmax.f32 %v1972_v1, 0.0  ;;  %v1970_v5 = vld [vmem:[%s2257_s27 + $0x148] sm:$0x3]  ;;  %v349_v6 = vmax.f32 %v1969_v2, 0.0  ;;  %v225_v7 = vld [vmem:[%s2257_s27 + $0x10] sm:$0xff] }
  0x19   : > { %v350_v8 = vmax.f32 %v1970_v5, 0.0  ;;  %v226_v9 = vld [vmem:[%s2257_s27 + $0x18] sm:$0x3]  ;;  %v245_v10 = vmax.f32 %v225_v7, 0.0  ;;  %v223_v11 = vld [vmem:[%s2257_s27] sm:$0xff]  ;;  %v1955_v22 = vld [vmem:[%s2257_s27 + $0xd0] sm:$0xff] }
  0x1a   : > { %v1953_v12 = vld [vmem:[%s2257_s27 + $0xc0] sm:$0xff]  ;;  %v2267_v13 = vpack.c.bf16 %v352_v4, %v351_v3  ;;  %v246_v14 = vmax.f32 %v226_v9, 0.0  ;;  %v224_v15 = vld [vmem:[%s2257_s27 + $0x8] sm:$0x3]  ;;  %v243_v16 = vmax.f32 %v223_v11, 0.0  ;;  %v302_v26 = vmax.f32 %v1955_v22, 0.0 }
  0x1b   : > { %v1954_v17 = vld [vmem:[%s2257_s27 + $0xc8] sm:$0x3]  ;;  %v2271_v18 = vpack.c.bf16 %v350_v8, %v349_v6  ;;  %v244_v19 = vmax.f32 %v224_v15, 0.0  ;;  %v300_v20 = vmax.f32 %v1953_v12, 0.0  ;;  %v1956_v23 = vld [vmem:[%s2257_s27 + $0xd8] sm:$0x3] }
  0x1c   : > { %v301_v21 = vmax.f32 %v1954_v17, 0.0  ;;  %1151 = vrot.lane.b32.xlu1 %v2267_v13, %s2177_s28  ;;  %v2277_v24 = vpack.c.bf16 %v246_v14, %v245_v10  ;;  %v1077_v25 = vshrl.u32 %v2267_v13, 16  ;;  %v303_v32 = vmax.f32 %v1956_v23, 0.0  ;;  %v1973_v46 = vld [vmem:[%s2257_s27 + $0x160] sm:$0xff]  ;;  %v1974_v47 = vld [vmem:[%s2257_s27 + $0x168] sm:$0x3] }
  0x1d   : > { %1149 = vrot.lane.b32.xlu0 %v2271_v18, %s2177_s28  ;;  %v2282_v27 = vpack.c.bf16 %v244_v19, %v243_v16  ;;  %v1070_v28 = vshrl.u32 %v2271_v18, 16  ;;  %v1073_v29 = vshll.u32 %v2271_v18, 16  ;;  %v1080_v38 = vshll.u32 %v2267_v13, 16  ;;  %v227_v58 = vld [vmem:[%s2257_s27 + $0x20] sm:$0xff]  ;;  %v228_v59 = vld [vmem:[%s2257_s27 + $0x28] sm:$0x3] }
  0x1e   : > { %v2286_v30 = vpack.c.bf16 %v301_v21, %v300_v20  ;;  %v460_v31 = vrot.slane %v2277_v24, 1  ;;  %v1079_v37 = vrot.slane %v1077_v25, 7  ;;  %v2296_v39 = vpack.c.bf16 %v303_v32, %v302_v26  ;;  %v1975_v15 = vld [vmem:[%s2257_s27 + $0x170] sm:$0xff]  ;;  %v1976_v16 = vld [vmem:[%s2257_s27 + $0x178] sm:$0x3]  ;;  %v1957_v32 = vld [vmem:[%s2257_s27 + $0xe0] sm:$0xff] }
  0x1f   : > { %v459_v33 = vrot.slane %v2282_v27, 1  ;;  %v1072_v34 = vrot.slane %v1070_v28, 7  ;;  %v389_v40 = vshll.u32 %v2277_v24, 16  ;;  %v382_v43 = vshll.u32 %v2282_v27, 16  ;;  %v229_v19 = vld [vmem:[%s2257_s27 + $0x30] sm:$0xff]  ;;  %s2188_s14 = smov 88  }
  0x20   : > { %v636_v35 = vshrl.u32 %v2286_v30, 16  ;;  %v638_v36 = vshll.u32 %v2286_v30, 16  ;;  %469 = vrot.lane.b32.xlu1 %v460_v31, %s2178_s29  ;;  %v643_v44 = vshrl.u32 %v2296_v39, 16  ;;  %v645_v45 = vshll.u32 %v2296_v39, 16  ;;  %v230_v20 = vld [vmem:[%s2257_s27 + $0x38] sm:$0x3] }
  0x21   : > { %467 = vrot.lane.b32.xlu0 %v459_v33, %s2178_s29  ;;  %v1075_v41 = vor.u32 %v1073_v29, %v1072_v34  ;;  %v1082_v49 = vor.u32 %v1080_v38, %v1079_v37  ;;  %v387_v51 = vshrl.u32 %v2277_v24, 16  ;;  %v391_v52 = vrot.slane %v389_v40, 1  ;;  %v1960_v26 = vld [vmem:[%s2257_s27 + $0xf8] sm:$0x3]  ;;  %v1958_v33 = vld [vmem:[%s2257_s27 + $0xe8] sm:$0x3] }
  0x22   : > { %v640_v42 = vrot.slane %v638_v36, 1  ;;  %v647_v50 = vrot.slane %v645_v45, 1  ;;  %v380_v53 = vshrl.u32 %v2282_v27, 16  ;;  %v384_v54 = vrot.slane %v382_v43, 1  ;;  %s2189_s13 = smov 96   ;;  %s2190_s22 = smov 104  }
  0x23   : > { %v353_v55 = vmax.f32 %v1973_v46, 0.0  ;;  %v354_v56 = vmax.f32 %v1974_v47, 0.0  ;;  %v392_v60 = vor.u32 %v391_v52, %v387_v51  ;;  %v1167_v61 = vrot.slane %v1080_v38, 1  ;;  %s2191_s24 = smov 112   ;;  %s2192_s25 = smov 120  }
  0x24   : > { %v2305_v48 = vor.u32 %v640_v42, %v636_v35  ;;  %1125 = vrot.lane.b32.xlu1 %v1075_v41, %s2178_s29  ;;  %v2312_v57 = vor.u32 %v647_v50, %v643_v44  ;;  %v385_v63 = vor.u32 %v384_v54, %v380_v53  ;;  %v1165_v0 = vrot.slane %v1073_v29, 1  ;;  %p213_p6 = scmp.lt.s32.totalorder %s2159_s15, 7 }
  0x25   : > { %v2317_v62 = vpack.c.bf16 %v354_v56, %v353_v55  ;;  %v247_v1 = vmax.f32 %v227_v58, 0.0  ;;  %v248_v2 = vmax.f32 %v228_v59, 0.0  ;;  %v1168_v3 = vor.u32 %v1167_v61, %v1077_v25  ;;  %v1959_v25 = vld [vmem:[%s2257_s27 + $0xf0] sm:$0xff] }
  0x26   : > { %1053 = vrot.lane.b32.xlu0 %v2305_v48, %s2179_s30  ;;  %v1166_v5 = vor.u32 %v1165_v0, %v1070_v28  ;;  %v355_v17 = vmax.f32 %v1975_v15, 0.0  ;;  %v356_v18 = vmax.f32 %v1976_v16, 0.0  ;;  %v249_v28 = vmax.f32 %v229_v19, 0.0  ;;  %v1952_v0 = vld [vmem:[%s2257_s27 + $0xb8] sm:$0x3]  ;;  %s3738_s15 = smov (!%p213_p6, %s2159_s15), 7 }
  0x27   : > { %v1084_v4 = vshrl.u32 %v2317_v62, 16  ;;  %v2324_v6 = vpack.c.bf16 %v248_v2, %v247_v1  ;;  %v1087_v8 = vshll.u32 %v2317_v62, 16  ;;  %v250_v29 = vmax.f32 %v230_v20, 0.0  ;;  %v1949_v1 = vld [vmem:[%s2257_s27 + $0xa0] sm:$0xff]  ;;  %v1950_v2 = vld [vmem:[%s2257_s27 + $0xa8] sm:$0x3] }
  0x28   : > { %1127 = vrot.lane.b32.xlu1 %v1082_v49, %s2178_s29  ;;  %v2354_v23 = vpack.c.bf16 %v356_v18, %v355_v17  ;;  %v306_v36 = vmax.f32 %v1959_v25, 0.0  ;;  %v307_v37 = vmax.f32 %v1960_v26, 0.0  ;;  %v305_v38 = vmax.f32 %v1958_v33, 0.0  ;;  %v1977_v17 = vld [vmem:[%s2257_s27 + $0x180] sm:$0xff]  ;;  %v1978_v18 = vld [vmem:[%s2257_s27 + $0x188] sm:$0x3] }
  0x29   : > { %3647 = vst [vmem:[#allocation2_spill] sm:$0xff] %v2324_v6  ;;  %v1086_v7 = vrot.slane %v1084_v4, 7  ;;  %v396_v9 = vshll.u32 %v2324_v6, 16  ;;  %v394_v11 = vshrl.u32 %v2324_v6, 16  ;;  %v2352_v21 = vrot.slane %v2324_v6, 1  ;;  %v2123_v20 = vld [vmem:[%s3613_s1] sm:$0xff]  }
  0x2a   : > { %1055 = vrot.lane.b32.xlu0 %v2312_v57, %s2179_s30  ;;  %v1169_v22 = vrot.slane %v1087_v8, 1  ;;  %v1091_v35 = vshrl.u32 %v2354_v23, 16  ;;  %v2370_v40 = vpack.c.bf16 %v250_v29, %v249_v28  ;;  %v1094_v42 = vshll.u32 %v2354_v23, 16  ;;  %v231_v28 = vld [vmem:[%s2257_s27 + $0x40] sm:$0xff]  ;;  %v232_v29 = vld [vmem:[%s2257_s27 + $0x48] sm:$0x3] }
  0x2b   : > { %v2332_v10 = vor.u32 %v1087_v8, %v1086_v7  ;;  %v398_v12 = vrot.slane %v396_v9, 1  ;;  %v2376_v44 = vpack.c.bf16 %v307_v37, %v306_v36  ;;  %v297_v7 = vmax.f32 %v1950_v2, 0.0  ;;  %v2131_v2 = vld [vmem:[%s3613_s1 + $0x40] sm:$0xff]  }
  0x2c   : > { %437 = vrot.lane.b32.xlu1 %v392_v60, %s2179_s30  ;;  %v2364_v34 = vor.u32 %v1169_v22, %v1084_v4  ;;  %3648 = vst [vmem:[#allocation3_spill] sm:$0xff] %v2370_v40  ;;  %v1093_v41 = vrot.slane %v1091_v35, 7  ;;  %v403_v43 = vshll.u32 %v2370_v40, 16  ;;  %v401_v46 = vshrl.u32 %v2370_v40, 16 }
  0x2d   : > { %v2339_v14 = vor.u32 %v398_v12, %v394_v11  ;;  %3649 = vst [vmem:[#allocation4_spill] sm:$0xff] %v2376_v44  ;;  %v657_v52 = vshrl.u32 %v2376_v44, 16  ;;  %v2413_v59 = vrot.slane %v2370_v40, 1  ;;  %v299_v4 = vmax.f32 %v1952_v0, 0.0  ;;  %v2130_v0 = vld [vmem:[%s3613_s1 + $0x38] sm:$0xff]  }
  0x2e   : > { %435 = vrot.lane.b32.xlu0 %v385_v63, %s2179_s30  ;;  %v405_v47 = vrot.slane %v403_v43, 1  ;;  %v1951_v63 = vld [vmem:[%s2257_s27 + $0xb0] sm:$0xff]  ;;  %v2187_v19 = vmov 0   ;;  %v357_v22 = vmax.f32 %v1977_v17, 0.0  ;;  %v358_v25 = vmax.f32 %v1978_v18, 0.0 }
  0x2f   : > { %1681 = vmatprep.subr.bf16.mxu0 %v2187_v19  ;;  %2037 = vmatprep.subr.bf16.mxu1 %v2187_v19  ;;  %v251_v33 = vmax.f32 %v231_v28, 0.0  ;;  %v2133_v18 = vld [vmem:[%s3613_s1 + $0x50] sm:$0xff]  }
  0x30   : > { %1183 = vrot.lane.b32.xlu1 %v1168_v3, %s2180_s5  ;;  %v2392_v51 = vor.u32 %v405_v47, %v401_v46  ;;  %1682 = vmatpush1.bf16.msra.mxu0 %v2123_v20  ;;  %v2477_v36 = vpack.c.bf16 %v358_v25, %v357_v22  ;;  %v2127_v47 = vld [vmem:[%s3613_s1 + $0x20] sm:$0xff]  }
  0x31   : > { %1683 = vmatprep.subr.bf16.mxu0 %v2187_v19  ;;  %2051 = vmatpush1.bf16.msra.mxu1 %v2123_v20 }
  0x32   : > { %1181 = vrot.lane.b32.xlu0 %v1166_v5, %s2180_s5  ;;  %v296_v5 = vmax.f32 %v1949_v1, 0.0  ;;  %2038 = vmatprep.subr.bf16.mxu1 %v2187_v19  ;;  %v1101_v43 = vshll.u32 %v2477_v36, 16 }
  0x34   : > { %486 = vrot.lane.b32.xlu1 %v2324_v6, %s2177_s28  ;;  %v2441_v9 = vpack.c.bf16 %v297_v7, %v296_v5  ;;  %v1979_v5 = vld [vmem:[%s2257_s27 + $0x190] sm:$0xff]  ;;  %v1980_v7 = vld [vmem:[%s2257_s27 + $0x198] sm:$0x3] }
  0x36   : > { %484 = vrot.lane.b32.xlu0 %v2277_v24, %s2177_s28  ;;  %v624_v11 = vshll.u32 %v2441_v9, 16  ;;  %v693_v46 = vrot.slane %v2441_v9, 1 }
  0x38   : > { %1206 = vrot.lane.b32.xlu1 %v2332_v10, %s2181_s6  ;;  %v626_v16 = vrot.slane %v624_v11, 1 }
  0x3a   : > { %1204 = vrot.lane.b32.xlu0 %v1082_v49, %s2181_s6  ;;  %v659_v49 = vshll.u32 %v2376_v44, 16 }
  0x3c   : > { %509 = vrot.lane.b32.xlu1 %v2339_v14, %s2180_s5  ;;  %v661_v53 = vrot.slane %v659_v49, 1 }
  0x3e   : > { %507 = vrot.lane.b32.xlu0 %v392_v60, %s2180_s5  ;;  %v2400_v56 = vor.u32 %v661_v53, %v657_v52  ;;  %v1171_v60 = vrot.slane %v1094_v42, 1  ;;  %v2128_v53 = vld [vmem:[%s3613_s1 + $0x28] sm:$0xff]  }
  0x40   : > { %1223 = vrot.lane.b32.xlu1 %v2317_v62, %s2182_s7  ;;  %3650 = vst [vmem:[#allocation5_spill] sm:$0xff] %v2400_v56  ;;  %v2423_v61 = vor.u32 %v1171_v60, %v1091_v35  ;;  %v252_v35 = vmax.f32 %v232_v29, 0.0  ;;  %v2129_v60 = vld [vmem:[%s3613_s1 + $0x30] sm:$0xff]   ;;  %v2134_v29 = vld [vmem:[%s3613_s1 + $0x58] sm:$0xff]  }
  0x42   : > { %1221 = vrot.lane.b32.xlu0 %v2267_v13, %s2182_s7  ;;  %v304_v13 = vmax.f32 %v1957_v32, 0.0  ;;  %v2124_v32 = vld [vmem:[%s3613_s1 + $0x8] sm:$0xff]   ;;  %v2487_v37 = vpack.c.bf16 %v252_v35, %v251_v33  ;;  %v1963_v35 = vld [vmem:[%s2257_s27 + $0x110] sm:$0xff] }
  0x43   : > { %1684 = vmatpush1.bf16.msra.mxu0 %v2124_v32  ;;  %2052 = vmatpush1.bf16.msra.mxu1 %v2124_v32 }
  0x44   : > { %526 = vrot.lane.b32.xlu1 %v2352_v21, %s2181_s6  ;;  %v2379_v45 = vpack.c.bf16 %v305_v38, %v304_v13  ;;  %1685 = vmatprep.subr.bf16.mxu0 %v2187_v19  ;;  %3651 = vst [vmem:[#allocation6_spill] sm:$0xff] %v2487_v37  ;;  %v1098_v13 = vshrl.u32 %v2477_v36, 16  ;;  %v2126_v38 = vld [vmem:[%s3613_s1 + $0x18] sm:$0xff]  }
  0x45   : > { %2039 = vmatprep.subr.bf16.mxu1 %v2187_v19 }
  0x46   : > { %524 = vrot.lane.b32.xlu0 %v460_v31, %s2181_s6  ;;  %v2383_v31 = vor.u32 %v1094_v42, %v1093_v41  ;;  %v652_v50 = vshll.u32 %v2379_v45, 16  ;;  %v650_v54 = vshrl.u32 %v2379_v45, 16  ;;  %v1100_v42 = vrot.slane %v1098_v13, 7 }
  0x48   : > { %1241 = vrot.lane.b32.xlu1 %v2364_v34, %s2183_s8  ;;  %v654_v55 = vrot.slane %v652_v50, 1  ;;  %v2515_v49 = vor.u32 %v1101_v43, %v1100_v42  ;;  %v408_v50 = vshrl.u32 %v2487_v37, 16  ;;  %v1962_v42 = vld [vmem:[%s2257_s27 + $0x108] sm:$0x3] }
  0x4a   : > { %1239 = vrot.lane.b32.xlu0 %v1168_v3, %s2183_s8  ;;  %v2404_v58 = vor.u32 %v654_v55, %v650_v54  ;;  %v298_v3 = vmax.f32 %v1951_v63, 0.0 }
  0x4c   : > { %543 = vrot.lane.b32.xlu1 %v2370_v40, %s2182_s7  ;;  %v2437_v8 = vpack.c.bf16 %v299_v4, %v298_v3  ;;  %v2568_v4 = vrot.slane %v2487_v37, 1 }
  0x4e   : > { %541 = vrot.lane.b32.xlu0 %v2324_v6, %s2182_s7  ;;  %v629_v12 = vshrl.u32 %v2437_v8, 16  ;;  %v694_v41 = vrot.slane %v2437_v8, 1 }
  0x50   : > { %1264 = vrot.lane.b32.xlu1 %v2383_v31, %s2184_s9 }
  0x52   : > { %1262 = vrot.lane.b32.xlu0 %v2332_v10, %s2184_s9 }
  0x54   : > { %566 = vrot.lane.b32.xlu1 %v2392_v51, %s2183_s8 }
  0x56   : > { %564 = vrot.lane.b32.xlu0 %v2339_v14, %s2183_s8 }
  0x58   : > { %1059 = vrot.lane.b32.xlu1 %v2400_v56, %s2179_s30 }
  0x5a   : > { %1057 = vrot.lane.b32.xlu0 %v2404_v58, %s2179_s30 }
  0x5c   : > { %1281 = vrot.lane.b32.xlu1 %v2354_v23, %s2185_s10 }
  0x5e   : > { %1279 = vrot.lane.b32.xlu0 %v2317_v62, %s2185_s10 }
  0x60   : > { %583 = vrot.lane.b32.xlu1 %v2413_v59, %s2184_s9 }
  0x62   : > { %581 = vrot.lane.b32.xlu0 %v2352_v21, %s2184_s9 }
  0x64   : > { %1131 = vrot.lane.b32.xlu1 %v2383_v31, %s2178_s29 }
  0x66   : > { %1129 = vrot.lane.b32.xlu0 %v2332_v10, %s2178_s29  ;;  %v631_v10 = vshll.u32 %v2437_v8, 16 }
  0x68   : > { %1299 = vrot.lane.b32.xlu1 %v2423_v61, %s2186_s11  ;;  %v633_v15 = vrot.slane %v631_v10, 1  ;;  %v2132_v10 = vld [vmem:[%s3613_s1 + $0x48] sm:$0xff]  }
  0x6a   : > { %1297 = vrot.lane.b32.xlu0 %v2364_v34, %s2186_s11 }
  0x6c   : > { %441 = vrot.lane.b32.xlu1 %v2392_v51, %s2179_s30 }
  0x6e   : > { %439 = vrot.lane.b32.xlu0 %v2339_v14, %s2179_s30  ;;  %v622_v14 = vshrl.u32 %v2441_v9, 16 }
  0x70   : > { %607 = vrot.lane.b32.xlu1 %v2437_v8, %s2185_s10  ;;  %v627_v26 = vor.u32 %v626_v16, %v622_v14  ;;  %v233_v14 = vld [vmem:[%s2257_s27 + $0x50] sm:$0xff]  ;;  %v234_v16 = vld [vmem:[%s2257_s27 + $0x58] sm:$0x3] }
  0x71   : > { %v253_v22 = vmax.f32 %v233_v14, 0.0  ;;  %v254_v25 = vmax.f32 %v234_v16, 0.0 }
  0x72   : > { %605 = vrot.lane.b32.xlu0 %v2441_v9, %s2185_s10 }
  0x73   : > { %v2619_v33 = vpack.c.bf16 %v254_v25, %v253_v22 }
  0x74   : > { %1155 = vrot.lane.b32.xlu1 %v2354_v23, %s2177_s28 }
  0x75   : > { %3652 = vst [vmem:[#allocation7_spill] sm:$0xff] %v2619_v33 }
  0x76   : > { %1153 = vrot.lane.b32.xlu0 %v2317_v62, %s2177_s28  ;;  %v2464_v62 = vor.u32 %v633_v15, %v629_v12  ;;  %v359_v12 = vmax.f32 %v1979_v5, 0.0  ;;  %v360_v15 = vmax.f32 %v1980_v7, 0.0 }
  0x78   : > { %473 = vrot.lane.b32.xlu1 %v2413_v59, %s2178_s29 }
  0x7a   : > { %471 = vrot.lane.b32.xlu0 %v2352_v21, %s2178_s29  ;;  %v2125_v21 = vld [vmem:[%s3613_s1 + $0x10] sm:$0xff]  }
  0x7b   : > { %1686 = vmatpush1.bf16.msra.mxu0 %v2125_v21  ;;  %2053 = vmatpush1.bf16.msra.mxu1 %v2125_v21  ;;  %v1964_v21 = vld [vmem:[%s2257_s27 + $0x118] sm:$0x3] }
  0x7c   : > { %679 = vrot.lane.b32.xlu1 %v2464_v62, %s2186_s11  ;;  %1687 = vmatprep.subr.bf16.mxu0 %v2187_v19 }
  0x7d   : > { %2040 = vmatprep.subr.bf16.mxu1 %v2187_v19 }
  0x7e   : > { %677 = vrot.lane.b32.xlu0 %v627_v26, %s2186_s11  ;;  %v2604_v26 = vpack.c.bf16 %v360_v15, %v359_v12  ;;  %v415_v12 = vshrl.u32 %v2619_v33, 16 }
  0x7f   : > { %1688 = vmatpush1.bf16.msra.mxu0 %v2126_v38  ;;  %2054 = vmatpush1.bf16.msra.mxu1 %v2126_v38  ;;  %v1961_v38 = vld [vmem:[%s2257_s27 + $0x100] sm:$0xff] }
  0x80   : > { %1187 = vrot.lane.b32.xlu1 %v2423_v61, %s2180_s5  ;;  %1689 = vmatprep.subr.bf16.mxu0 %v2187_v19 }
  0x81   : > { %2041 = vmatprep.subr.bf16.mxu1 %v2187_v19 }
  0x82   : > { %1185 = vrot.lane.b32.xlu0 %v2364_v34, %s2180_s5  ;;  %v410_v34 = vshll.u32 %v2487_v37, 16 }
  0x83   : > { %1690 = vmatpush1.bf16.msra.mxu0 %v2127_v47  ;;  %2055 = vmatpush1.bf16.msra.mxu1 %v2127_v47  ;;  %v417_v47 = vshll.u32 %v2619_v33, 16 }
  0x84   : > { %490 = vrot.lane.b32.xlu1 %v2487_v37, %s2177_s28  ;;  %v412_v52 = vrot.slane %v410_v34, 1  ;;  %1691 = vmatprep.subr.bf16.mxu0 %v2187_v19 }
  0x85   : > { %2042 = vmatprep.subr.bf16.mxu1 %v2187_v19  ;;  %v419_v15 = vrot.slane %v417_v47, 1 }
  0x86   : > { %488 = vrot.lane.b32.xlu0 %v2370_v40, %s2177_s28  ;;  %v2526_v54 = vor.u32 %v412_v52, %v408_v50  ;;  %v3619_v50 = vshll.u32 %v2604_v26, 16  ;;  %v310_v52 = vmax.f32 %v1963_v35, 0.0 }
  0x87   : > { %1692 = vmatpush1.bf16.msra.mxu0 %v2128_v53  ;;  %2056 = vmatpush1.bf16.msra.mxu1 %v2128_v53  ;;  %v311_v53 = vmax.f32 %v1964_v21, 0.0  ;;  %v2677_v22 = vor.u32 %v419_v15, %v415_v12  ;;  %v1965_v21 = vld [vmem:[%s2257_s27 + $0x120] sm:$0xff] }
  0x88   : > { %703 = vrot.lane.b32.xlu1 %v694_v41, %s2188_s14  ;;  %1693 = vmatprep.subr.bf16.mxu0 %v2187_v19 }
  0x89   : > { %2043 = vmatprep.subr.bf16.mxu1 %v2187_v19  ;;  %v2664_v14 = vpack.c.bf16 %v311_v53, %v310_v52 }
  0x8a   : > { %701 = vrot.lane.b32.xlu0 %v693_v46, %s2188_s14  ;;  %v3617_v46 = vrot.slane %v2286_v30, 1 }
  0x8b   : > { %1694 = vmatpush1.bf16.msra.mxu0 %v2129_v60  ;;  %2057 = vmatpush1.bf16.msra.mxu1 %v2129_v60  ;;  %v308_v60 = vmax.f32 %v1961_v38, 0.0  ;;  %3653 = vst [vmem:[#allocation8_spill] sm:$0xff] %v2664_v14  ;;  %v673_v25 = vshll.u32 %v2664_v14, 16  ;;  %v1966_v38 = vld [vmem:[%s2257_s27 + $0x128] sm:$0x3] }
  0x8c   : > { %1210 = vrot.lane.b32.xlu1 %v2515_v49, %s2181_s6  ;;  %1695 = vmatprep.subr.bf16.mxu0 %v2187_v19 }
  0x8d   : > { %2044 = vmatprep.subr.bf16.mxu1 %v2187_v19  ;;  %v675_v47 = vrot.slane %v673_v25, 1 }
  0x8e   : > { %1208 = vrot.lane.b32.xlu0 %v2383_v31, %s2181_s6  ;;  %v2531_v55 = vpop.permute.xlu1 %1151 }
  0x8f   : > { %v2536_v63 = vpop.permute.xlu0 %1149  ;;  %1696 = vmatpush1.bf16.msra.mxu0 %v2130_v0  ;;  %2058 = vmatpush1.bf16.msra.mxu1 %v2130_v0  ;;  %v309_v0 = vmax.f32 %v1962_v42, 0.0 }
  0x90   : > { %513 = vrot.lane.b32.xlu1 %v2526_v54, %s2180_s5  ;;  %1697 = vmatprep.subr.bf16.mxu0 %v2187_v19 }
  0x91   : > { %2045 = vmatprep.subr.bf16.mxu1 %v2187_v19 }
  0x92   : > { %511 = vrot.lane.b32.xlu0 %v2392_v51, %s2180_s5  ;;  %v2544_v31 = vpop.permute.xlu1 %469 }
  0x93   : > { %v2549_v1 = vpop.permute.xlu0 %467  ;;  %1698 = vmatpush1.bf16.msra.mxu0 %v2131_v2  ;;  %2059 = vmatpush1.bf16.msra.mxu1 %v2131_v2  ;;  %v2136_v2 = vld [vmem:[%s3613_s1 + $0x68] ss:$0 sps:$4 sm:$0xff]  }
  0x94   : > { %720 = vrot.lane.b32.xlu1 %v2286_v30, %s2189_s13  ;;  %1699 = vmatprep.subr.bf16.mxu0 %v2187_v19 }
  0x95   : > { %2046 = vmatprep.subr.bf16.mxu1 %v2187_v19 }
  0x96   : > { %718 = vrot.lane.b32.xlu0 %v2437_v8, %s2189_s13  ;;  %v2557_v51 = vpop.permute.xlu1 %1125 }
  0x97   : > { %1700 = vmatpush1.bf16.msra.mxu0 %v2132_v10  ;;  %2060 = vmatpush1.bf16.msra.mxu1 %v2132_v10  ;;  %v1679_v10 = vsel %vm1677_vm0, %v2136_v2, 0  ;;  %v313_v2 = vmax.f32 %v1966_v38, 0.0 }
  0x98   : > { %v2562_v3 = vpop.permute.xlu0 %1053  ;;  %1227 = vrot.lane.b32.xlu1 %v2477_v36, %s2182_s7  ;;  %1701 = vmatprep.subr.bf16.mxu0 %v2187_v19 }
  0x99   : > { %2047 = vmatprep.subr.bf16.mxu1 %v2187_v19 }
  0x9a   : > { %1225 = vrot.lane.b32.xlu0 %v2354_v23, %s2182_s7  ;;  %v2575_v9 = vpop.permute.xlu1 %1127  ;;  %v1173_v23 = vrot.slane %v1101_v43, 1  ;;  %v2135_v43 = vld [vmem:[%s3613_s1 + $0x60] sm:$0xff]  }
  0x9b   : > { %1702 = vmatpush1.bf16.msra.mxu0 %v2133_v18  ;;  %2061 = vmatpush1.bf16.msra.mxu1 %v2133_v18 }
  0x9c   : > { %v2580_v11 = vpop.permute.xlu0 %1055  ;;  %530 = vrot.lane.b32.xlu1 %v2568_v4, %s2181_s6  ;;  %1703 = vmatprep.subr.bf16.mxu0 %v2187_v19 }
  0x9d   : > { %2048 = vmatprep.subr.bf16.mxu1 %v2187_v19 }
  0x9e   : > { %528 = vrot.lane.b32.xlu0 %v2413_v59, %s2181_s6  ;;  %v2590_v17 = vpop.permute.xlu1 %437  ;;  %v2602_v59 = vor.u32 %v1173_v23, %v1098_v13 }
  0x9f   : > { %1704 = vmatpush1.bf16.msra.mxu0 %v2134_v29  ;;  %2062 = vmatpush1.bf16.msra.mxu1 %v2134_v29  ;;  %v1968_v29 = vld [vmem:[%s2257_s27 + $0x138] sm:$0x3] }
  0xa0   : > { %v2595_v20 = vpop.permute.xlu0 %435  ;;  %743 = vrot.lane.b32.xlu1 %v2305_v48, %s2190_s22  ;;  %1705 = vmatprep.subr.bf16.mxu0 %v2187_v19  ;;  %v315_v52 = vmax.f32 %v1968_v29, 0.0 }
  0xa1   : > { %2049 = vmatprep.subr.bf16.mxu1 %v2187_v19 }
  0xa2   : > { %741 = vrot.lane.b32.xlu0 %v2464_v62, %s2190_s22  ;;  %v2609_v28 = vpop.permute.xlu1 %1183  ;;  %v3618_v62 = vshrl.u32 %v2604_v26, 16 }
  0xa3   : > { %1706 = vmatpush1.bf16.msra.mxu0 %v2135_v43  ;;  %2063 = vmatpush1.bf16.msra.mxu1 %v2135_v43  ;;  %v671_v43 = vshrl.u32 %v2664_v14, 16  ;;  %v1982_v14 = vld [vmem:[%s2257_s27 + $0x1a8] sm:$0x3] }
  0xa4   : > { %v2614_v32 = vpop.permute.xlu0 %1181  ;;  %1245 = vrot.lane.b32.xlu1 %v2602_v59, %s2183_s8  ;;  %1707 = vmatprep.subr.bf16.mxu0 %v2187_v19 }
  0xa5   : > { %2050 = vmatprep.subr.bf16.mxu1 %v2187_v19  ;;  %v2669_v19 = vpack.c.bf16 %v309_v0, %v308_v60  ;;  %v312_v0 = vmax.f32 %v1965_v21, 0.0  ;;  %v2703_v15 = vor.u32 %v675_v47, %v671_v43 }
  0xa6   : > { %1243 = vrot.lane.b32.xlu0 %v2423_v61, %s2183_s8  ;;  %v2627_v13 = vpop.permute.xlu1 %486  ;;  %v1107_v61 = vrot.slane %v3618_v62, 7 }
  0xa7   : > { %1708 = vmatpush1.bf16.msra.mxu0 %v1679_v10  ;;  %3654 = vst [vmem:[#allocation9_spill] sm:$0xff] %v2669_v19  ;;  %2064 = vmatpush1.bf16.msra.mxu1 %v1679_v10  ;;  %v666_v8 = vshll.u32 %v2669_v19, 16  ;;  %v664_v53 = vshrl.u32 %v2669_v19, 16  ;;  %3655 = vst [vmem:[#allocation10_spill] sm:$0xff] %v2703_v15  ;;  %v1981_v19 = vld [vmem:[%s2257_s27 + $0x1a0] sm:$0xff] }
  0xa8   : > { %v2634_v34 = vpop.permute.xlu0 %484  ;;  %547 = vrot.lane.b32.xlu1 %v2619_v33, %s2182_s7  ;;  %v2661_v23 = vor.u32 %v3619_v50, %v1107_v61 }
  0xa9   : > { %v668_v60 = vrot.slane %v666_v8, 1  ;;  %v2711_v8 = vpack.c.bf16 %v313_v2, %v312_v0 }
  0xaa   : > { %545 = vrot.lane.b32.xlu0 %v2487_v37, %s2182_s7  ;;  %v2650_v5 = vpop.permute.xlu1 %1206 }
  0xab   : > { %3658 = vst [vmem:[#allocation13_spill] sm:$0xff] %v2711_v8  ;;  %v737_v43 = vshll.u32 %v2711_v8, 16  ;;  %v735_v0 = vshrl.u32 %v2711_v8, 16 }
  0xac   : > { %v2652_v7 = vpop.permute.xlu0 %1204  ;;  %760 = vrot.lane.b32.xlu1 %v3617_v46, %s2191_s24 }
  0xad   : > { %v739_v2 = vrot.slane %v737_v43, 1 }
  0xae   : > { %758 = vrot.lane.b32.xlu0 %v694_v41, %s2191_s24  ;;  %v2671_v16 = vpop.permute.xlu1 %509  ;;  %v1967_v41 = vld [vmem:[%s2257_s27 + $0x130] sm:$0xff] }
  0xaf   : > { %v314_v61 = vmax.f32 %v1967_v41, 0.0  ;;  %v2709_v41 = vor.u32 %v668_v60, %v664_v53 }
  0xb0   : > { %v2673_v18 = vpop.permute.xlu0 %507  ;;  %1268 = vrot.lane.b32.xlu1 %v2661_v23, %s2184_s9 }
  0xb1   : > { %v2705_v25 = vpack.c.bf16 %v315_v52, %v314_v61  ;;  %3657 = vst [vmem:[#allocation12_spill] sm:$0xff] %v2709_v41  ;;  %v2730_v52 = vrot.slane %v2619_v33, 1 }
  0xb2   : > { %1266 = vrot.lane.b32.xlu0 %v2515_v49, %s2184_s9  ;;  %v2685_v35 = vpop.permute.xlu1 %1223 }
  0xb3   : > { %3656 = vst [vmem:[#allocation11_spill] sm:$0xff] %v2705_v25  ;;  %v1049_v38 = vshll.u32 %v2705_v25, 16  ;;  %v1047_v53 = vshrl.u32 %v2705_v25, 16 }
  0xb4   : > { %v2689_v42 = vpop.permute.xlu0 %1221  ;;  %570 = vrot.lane.b32.xlu1 %v2677_v22, %s2183_s8 }
  0xb5   : > { %v1051_v60 = vrot.slane %v1049_v38, 1  ;;  %v2746_v38 = vor.u32 %v739_v2, %v735_v0  ;;  %v361_v0 = vmax.f32 %v1981_v19, 0.0  ;;  %v362_v2 = vmax.f32 %v1982_v14, 0.0  ;;  %v237_v14 = vld [vmem:[%s2257_s27 + $0x70] sm:$0xff]  ;;  %v238_v19 = vld [vmem:[%s2257_s27 + $0x78] sm:$0x3] }
  0xb6   : > { %568 = vrot.lane.b32.xlu0 %v2526_v54, %s2183_s8  ;;  %v2697_v10 = vpop.permute.xlu1 %526 }
  0xb7   : > { %v1052_v50 = vor.u32 %v1051_v60, %v1047_v53  ;;  %3659 = vst [vmem:[#allocation14_spill] sm:$0xff] %v2746_v38  ;;  %v3660_v53 = vshll.u32 %v2604_v26, 16 }
  0xb8   : > { %v2699_v12 = vpop.permute.xlu0 %524  ;;  %777 = vrot.lane.b32.xlu1 %v2296_v39, %s2192_s25 }
  0xb9   : > { %v1175_v60 = vrot.slane %v3660_v53, 1  ;;  %v235_v53 = vld [vmem:[%s2257_s27 + $0x60] sm:$0xff] }
  0xba   : > { %775 = vrot.lane.b32.xlu0 %v2286_v30, %s2192_s25  ;;  %v2713_v29 = vpop.permute.xlu1 %1241  ;;  %v255_v44 = vmax.f32 %v235_v53, 0.0 }
  0xbc   : > { %v2715_v21 = vpop.permute.xlu0 %1239  ;;  %1063 = vrot.lane.b32.xlu1 %v2703_v15, %s2179_s30  ;;  %v1984_v15 = vld [vmem:[%s2257_s27 + $0x1b8] sm:$0x3] }
  0xbd   : > { %v364_v25 = vmax.f32 %v1984_v15, 0.0 }
  0xbe   : > { %1061 = vrot.lane.b32.xlu0 %v2709_v41, %s2179_s30  ;;  %v2723_v47 = vpop.permute.xlu1 %543  ;;  %v1983_v41 = vld [vmem:[%s2257_s27 + $0x1b0] sm:$0xff] }
  0xbf   : > { %v363_v8 = vmax.f32 %v1983_v41, 0.0  ;;  %v2773_v41 = vpack.c.bf16 %v362_v2, %v361_v0  ;;  %v258_v0 = vmax.f32 %v238_v19, 0.0 }
  0xc0   : > { %v2725_v61 = vpop.permute.xlu0 %541  ;;  %1285 = vrot.lane.b32.xlu1 %v2604_v26, %s2185_s10 }
  0xc1   : > { %v2763_v40 = vpack.c.bf16 %v364_v25, %v363_v8  ;;  %v1316_v25 = vsel %vm791_vm1, %v2296_v39, %v2580_v11 }
  0xc2   : > { %1283 = vrot.lane.b32.xlu0 %v2477_v36, %s2185_s10  ;;  %v2736_v46 = vpop.permute.xlu1 %1264  ;;  %v1332_v2 = vsel %vm808_vm2, %v1316_v25, %v2575_v9 }
  0xc3   : > { %v3664_v9 = vshrl.u32 %v2763_v40, 16  ;;  %v1348_v25 = vsel %vm825_vm3, %v1332_v2, %v2531_v55  ;;  %v3665_v55 = vshrl.u32 %v2773_v41, 16 }
  0xc4   : > { %v2738_v62 = vpop.permute.xlu0 %1262  ;;  %587 = vrot.lane.b32.xlu1 %v2730_v52, %s2184_s9 }
  0xc5   : > { %v1121_v19 = vrot.slane %v3664_v9, 7  ;;  %v1114_v2 = vrot.slane %v3665_v55, 7 }
  0xc6   : > { %585 = vrot.lane.b32.xlu0 %v2568_v4, %s2184_s9  ;;  %v2748_v56 = vpop.permute.xlu1 %566 }
  0xc8   : > { %v2752_v43 = vpop.permute.xlu0 %564  ;;  %1067 = vrot.lane.b32.xlu1 %v1052_v50, %s2179_s30  ;;  %v3663_v50 = vshrl.u32 %v2604_v26, 16 }
  0xca   : > { %1065 = vrot.lane.b32.xlu0 %v2746_v38, %s2179_s30  ;;  %v2759_v37 = vpop.permute.xlu1 %1059  ;;  %v2769_v15 = vor.u32 %v1175_v60, %v3663_v50  ;;  %v236_v38 = vld [vmem:[%s2257_s27 + $0x68] sm:$0x3]  ;;  %v1314_v60 = vsel %vm791_vm1, %v2286_v30, %v2562_v3 }
  0xcb   : > { %3661 = vst [vmem:[#allocation15_spill] sm:$0xff] %v2759_v37  ;;  %v256_v37 = vmax.f32 %v236_v38, 0.0  ;;  %v1330_v3 = vsel %vm808_vm2, %v1314_v60, %v2557_v51  ;;  %v1115_v38 = vshll.u32 %v2773_v41, 16  ;;  %v1364_v60 = vsel %vm842_vm4, %v1348_v25, %v2609_v28 }
  0xcc   : > { %v2761_v6 = vpop.permute.xlu0 %1057  ;;  %1135 = vrot.lane.b32.xlu1 %v2661_v23, %s2178_s29  ;;  %v1346_v11 = vsel %vm825_vm3, %v1330_v3, %v2536_v63 }
  0xcd   : > { %3662 = vst [vmem:[#allocation16_spill] sm:$0xff] %v2761_v6  ;;  %v2817_v9 = vpack.c.bf16 %v256_v37, %v255_v44  ;;  %v1362_v51 = vsel %vm842_vm4, %v1346_v11, %v2614_v32  ;;  %v3666_v32 = vshll.u32 %v2763_v40, 16 }
  0xce   : > { %1133 = vrot.lane.b32.xlu0 %v2515_v49, %s2178_s29  ;;  %v1282_v8 = vpop.permute.xlu1 %1281  ;;  %v257_v49 = vmax.f32 %v237_v14, 0.0  ;;  %v1378_v63 = vsel %vm859_vm5, %v1362_v51, %v2652_v7 }
  0xcf   : > { %v1394_v44 = vsel %vm876_vm6, %v1378_v63, %v2689_v42  ;;  %v2850_v42 = vor.u32 %v1115_v38, %v1114_v2 }
  0xd0   : > { %v1280_v50 = vpop.permute.xlu0 %1279  ;;  %1303 = vrot.lane.b32.xlu1 %v2769_v15, %s2186_s11  ;;  %v2807_v53 = vpack.c.bf16 %v258_v0, %v257_v49  ;;  %v1380_v49 = vsel %vm859_vm5, %v1364_v60, %v2650_v5  ;;  %v2839_v5 = vor.u32 %v3666_v32, %v1121_v19 }
  0xd1   : > { %3667 = vst [vmem:[#allocation17_spill] sm:$0xff] %v2850_v42 }
  0xd2   : > { %1301 = vrot.lane.b32.xlu0 %v2602_v59, %s2186_s11  ;;  %v2795_v6 = vpop.permute.xlu1 %583  ;;  %v431_v7 = vshll.u32 %v2807_v53, 16  ;;  %v429_v2 = vshrl.u32 %v2807_v53, 16 }
  0xd4   : > { %v2797_v14 = vpop.permute.xlu0 %581  ;;  %445 = vrot.lane.b32.xlu1 %v2677_v22, %s2179_s30 }
  0xd6   : > { %443 = vrot.lane.b32.xlu0 %v2526_v54, %s2179_s30  ;;  %v2823_v0 = vpop.permute.xlu1 %1131  ;;  %v1396_v54 = vsel %vm876_vm6, %v1380_v49, %v2685_v35  ;;  %v1410_v35 = vsel %vm893_vm7, %v1394_v44, %v2715_v21  ;;  %v433_v49 = vrot.slane %v431_v7, 1 }
  0xd7   : > { %v1412_v37 = vsel %vm893_vm7, %v1396_v54, %v2713_v29  ;;  %v424_v29 = vshll.u32 %v2817_v9, 16  ;;  %v1426_v3 = vsel %vm910_vm8, %v1410_v35, %v2738_v62  ;;  %v422_v62 = vshrl.u32 %v2817_v9, 16 }
  0xd8   : > { %v2829_v28 = vpop.permute.xlu0 %1129  ;;  %611 = vrot.lane.b32.xlu1 %v2296_v39, %s2185_s10  ;;  %v1428_v11 = vsel %vm910_vm8, %v1412_v37, %v2736_v46  ;;  %v1442_v21 = vsel %vm927_vm9, %v1426_v3, %v1280_v50 }
  0xd9   : > { %v1444_v19 = vsel %vm927_vm9, %v1428_v11, %v1282_v8  ;;  %v426_v8 = vrot.slane %v424_v29, 1  ;;  %v2871_v11 = vor.u32 %v433_v49, %v429_v2 }
  0xda   : > { %609 = vrot.lane.b32.xlu0 %v2286_v30, %s2185_s10  ;;  %v1300_v25 = vpop.permute.xlu1 %1299 }
  0xdb   : > { %v1460_v51 = vsel %vm944_vm10, %v1444_v19, %v1300_v25  ;;  %v2875_v3 = vor.u32 %v426_v8, %v422_v62 }
  0xdc   : > { %v1298_v46 = vpop.permute.xlu0 %1297  ;;  %v1481_v60 = vshll.u32 %v1460_v51, 16  ;;  %1139 = vrot.lane.b32.xlu1 %v2839_v5, %s2178_s29  ;;  %v1479_v50 = vshrl.u32 %v1460_v51, 16 }
  0xdd   : > { %v1458_v55 = vsel %vm944_vm10, %v1442_v21, %v1298_v46  ;;  %3670 = vst [vmem:[#allocation20_spill] sm:$0xff] %v2875_v3 }
  0xde   : > { %v1475_v63 = vshll.u32 %v1458_v55, 16  ;;  %1137 = vrot.lane.b32.xlu0 %v2850_v42, %s2178_s29  ;;  %v1483_v54 = vrot.slane %v1481_v60, 1  ;;  %v2865_v44 = vpop.permute.xlu1 %441  ;;  %v1473_v37 = vshrl.u32 %v1458_v55, 16 }
  0xdf   : > { %3668 = vst [vmem:[#allocation18_spill] sm:$0xff] %v2865_v44  ;;  %v1986_v44 = vld [vmem:[%s2257_s27 + $0x1c8] sm:$0x3] }
  0xe0   : > { %v1477_v32 = vrot.slane %v1475_v63, 1  ;;  %v2867_v35 = vpop.permute.xlu0 %439  ;;  %1159 = vrot.lane.b32.xlu1 %v2604_v26, %s2177_s28  ;;  %v1484_v7 = vor.u32 %v1483_v54, %v1479_v50  ;;  %v2917_v63 = vrot.slane %v2807_v53, 1  ;;  %v3676_v54 = vshll.u32 %v2763_v40, 16 }
  0xe1   : > { %3669 = vst [vmem:[#allocation19_spill] sm:$0xff] %v2867_v35  ;;  %v1985_v35 = vld [vmem:[%s2257_s27 + $0x1c0] sm:$0xff] }
  0xe2   : > { %1157 = vrot.lane.b32.xlu0 %v2477_v36, %s2177_s28  ;;  %v1478_v29 = vor.u32 %v1477_v32, %v1473_v37  ;;  %v2877_v19 = vpop.permute.xlu1 %607  ;;  %v1179_v37 = vrot.slane %v3676_v54, 1  ;;  %v3641_v32 = vrot.slane %v2296_v39, 1  ;;  %v3679_v54 = vshrl.u32 %v2763_v40, 16 }
  0xe4   : > { %v2879_v25 = vpop.permute.xlu0 %605  ;;  %v1990_v21 = vcombine.low %v1478_v29, %v1484_v7  ;;  %449 = vrot.lane.b32.xlu1 %v2871_v11, %s2179_s30  ;;  %v1177_v7 = vrot.slane %v1115_v38, 1  ;;  %v3681_v38 = vshrl.u32 %v2773_v41, 16 }
  0xe6   : > { %447 = vrot.lane.b32.xlu0 %v2875_v3, %s2179_s30  ;;  %2011 = vmatprep.mubr.msk.bf16.mxu0 %vm961_vm11, %v1990_v21  ;;  %v2886_v51 = vpop.permute.xlu1 %1155  ;;  %s1947_s30 = sshll.u32 %s3736_s16, 6 }
  0xe8   : > { %v2888_v36 = vpop.permute.xlu0 %1153  ;;  %477 = vrot.lane.b32.xlu1 %v2730_v52, %s2178_s29 }
  0xea   : > { %475 = vrot.lane.b32.xlu0 %v2568_v4, %s2178_s29  ;;  %v2894_v46 = vpop.permute.xlu1 %473 }
  0xeb   : > { %3671 = vst [vmem:[#allocation21_spill] sm:$0xff] %v2894_v46  ;;  %v240_v46 = vld [vmem:[%s2257_s27 + $0x88] sm:$0x3] }
  0xec   : > { %v2896_v60 = vpop.permute.xlu0 %471  ;;  %683 = vrot.lane.b32.xlu1 %v2312_v57, %s2186_s11 }
  0xed   : > { %3672 = vst [vmem:[#allocation22_spill] sm:$0xff] %v2896_v60  ;;  %v3680_v60 = vrot.slane %v2286_v30, 1 }
  0xee   : > { %681 = vrot.lane.b32.xlu0 %v2305_v48, %s2186_s11  ;;  %v2902_v55 = vpop.permute.xlu1 %679  ;;  %v2922_v48 = vrot.slane %v2817_v9, 1 }
  0xf0   : > { %v2904_v2 = vpop.permute.xlu0 %677  ;;  %1163 = vrot.lane.b32.xlu1 %v2763_v40, %s2177_s28 }
  0xf2   : > { %1161 = vrot.lane.b32.xlu0 %v2773_v41, %s2177_s28  ;;  %v2910_v4 = vpop.permute.xlu1 %1187 }
  0xf4   : > { %v2912_v49 = vpop.permute.xlu0 %1185  ;;  %1191 = vrot.lane.b32.xlu1 %v2769_v15, %s2180_s5 }
  0xf5   : > { %3673 = vst [vmem:[#allocation23_spill] sm:$0xff] %v2912_v49  ;;  %v366_v49 = vmax.f32 %v1986_v44, 0.0 }
  0xf6   : > { %1189 = vrot.lane.b32.xlu0 %v2602_v59, %s2180_s5  ;;  %v2924_v62 = vpop.permute.xlu1 %490 }
  0xf7   : > { %3674 = vst [vmem:[#allocation24_spill] sm:$0xff] %v2924_v62  ;;  %v239_v62 = vld [vmem:[%s2257_s27 + $0x80] sm:$0xff] }
  0xf8   : > { %v2926_v8 = vpop.permute.xlu0 %488  ;;  %481 = vrot.lane.b32.xlu1 %v2917_v63, %s2178_s29 }
  0xf9   : > { %3675 = vst [vmem:[#allocation25_spill] sm:$0xff] %v2926_v8  ;;  %v2954_v8 = vor.u32 %v1179_v37, %v3679_v54  ;;  %v259_v37 = vmax.f32 %v239_v62, 0.0  ;;  %v260_v54 = vmax.f32 %v240_v46, 0.0 }
  0xfa   : > { %479 = vrot.lane.b32.xlu0 %v2922_v48, %s2178_s29  ;;  %v2932_v50 = vpop.permute.xlu1 %703  ;;  %s1946_s29 = sshll.u32 %s3738_s15, 3 }
  0xfc   : > { %v2934_v59 = vpop.permute.xlu0 %701  ;;  %494 = vrot.lane.b32.xlu1 %v2817_v9, %s2177_s28 }
  0xfe   : > { %492 = vrot.lane.b32.xlu0 %v2619_v33, %s2177_s28  ;;  %v2945_v29 = vpop.permute.xlu1 %1210  ;;  %v2962_v33 = vor.u32 %v1177_v7, %v3681_v38  ;;  %v2981_v7 = vpack.c.bf16 %v260_v54, %v259_v37 }
  0xff   : > { %3677 = vst [vmem:[#allocation26_spill] sm:$0xff] %v2945_v29 }
 0x100   : > { %v2947_v21 = vpop.permute.xlu0 %1208  ;;  %707 = vrot.lane.b32.xlu1 %v3641_v32, %s2188_s14  ;;  %v365_v32 = vmax.f32 %v1985_v35, 0.0 }
 0x101   : > { %3678 = vst [vmem:[#allocation27_spill] sm:$0xff] %v2947_v21 }
 0x102   : > { %705 = vrot.lane.b32.xlu0 %v3680_v60, %s2188_s14  ;;  %v2967_v21 = vpop.permute.xlu1 %513  ;;  %v2983_v38 = vpack.c.bf16 %v366_v49, %v365_v32 }
 0x103   : > { %3682 = vst [vmem:[#allocation28_spill] sm:$0xff] %v2967_v21 }
 0x104   : > { %v2969_v29 = vpop.permute.xlu0 %511  ;;  %1195 = vrot.lane.b32.xlu1 %v2954_v8, %s2180_s5  ;;  %v3642_v35 = vshrl.u32 %v2983_v38, 16  ;;  %v3643_v49 = vshll.u32 %v2983_v38, 16 }
 0x105   : > { %3683 = vst [vmem:[#allocation29_spill] sm:$0xff] %v2969_v29 }
 0x106   : > { %1193 = vrot.lane.b32.xlu0 %v2962_v33, %s2180_s5  ;;  %v2975_v30 = vpop.permute.xlu1 %720 }
 0x108   : > { %v2977_v60 = vpop.permute.xlu0 %718  ;;  %1214 = vrot.lane.b32.xlu1 %v2850_v42, %s2181_s6  ;;  %v793_v42 = vsel %vm791_vm1, %v2282_v27, %v2595_v20 }
 0x10a   : > { %1212 = vrot.lane.b32.xlu0 %v2661_v23, %s2181_s6  ;;  %v2987_v46 = vpop.permute.xlu1 %1227  ;;  %v1200_v23 = vrot.slane %v3642_v35, 7 }
 0x10c   : > { %v2989_v44 = vpop.permute.xlu0 %1225  ;;  %498 = vrot.lane.b32.xlu1 %v2981_v7, %s2177_s28 }
 0x10e   : > { %496 = vrot.lane.b32.xlu0 %v2807_v53, %s2177_s28  ;;  %v2996_v62 = vpop.permute.xlu1 %530 }
 0x10f   : > { %3684 = vst [vmem:[#allocation30_spill] sm:$0xff] %v2996_v62  ;;  %v3011_v62 = vor.u32 %v3643_v49, %v1200_v23  ;;  %v795_v49 = vsel %vm791_vm1, %v2277_v24, %v2590_v17  ;;  %v810_v17 = vsel %vm808_vm2, %v793_v42, %v2549_v1 }
 0x110   : > { %v2998_v37 = vpop.permute.xlu0 %528  ;;  %517 = vrot.lane.b32.xlu1 %v2875_v3, %s2180_s5  ;;  %v827_v27 = vsel %vm825_vm3, %v810_v17, %v2634_v34 }
 0x111   : > { %3685 = vst [vmem:[#allocation31_spill] sm:$0xff] %v2998_v37  ;;  %3686 = vst [vmem:[#allocation32_spill] sm:$0xff] %v3011_v62  ;;  %v503_v37 = vshll.u32 %v2981_v7, 16 }
 0x112   : > { %515 = vrot.lane.b32.xlu0 %v2677_v22, %s2180_s5  ;;  %v744_v32 = vpop.permute.xlu1 %743  ;;  %v501_v22 = vshrl.u32 %v2981_v7, 16 }
 0x113   : > { %v505_v21 = vrot.slane %v503_v37, 1  ;;  %v812_v37 = vsel %vm808_vm2, %v795_v49, %v2544_v31  ;;  %v844_v31 = vsel %vm842_vm4, %v827_v27, %v2673_v18 }
 0x114   : > { %v742_v54 = vpop.permute.xlu0 %741  ;;  %724 = vrot.lane.b32.xlu1 %v2379_v45, %s2189_s13  ;;  %v829_v24 = vsel %vm825_vm3, %v812_v37, %v2627_v13  ;;  %v861_v1 = vsel %vm859_vm5, %v844_v31, %v2699_v12 }
 0x115   : > { %v846_v20 = vsel %vm842_vm4, %v829_v24, %v2671_v16  ;;  %v878_v16 = vsel %vm876_vm6, %v861_v1, %v2725_v61  ;;  %v3691_v1 = vld [vmem:[#allocation4_spill] sm:$0xff] }
 0x116   : > { %722 = vrot.lane.b32.xlu0 %v2296_v39, %s2189_s13  ;;  %v3016_v35 = vpop.permute.xlu1 %1245 }
 0x118   : > { %v3018_v29 = vpop.permute.xlu0 %1243  ;;  %1218 = vrot.lane.b32.xlu1 %v3011_v62, %s2181_s6  ;;  %v3037_v62 = vor.u32 %v505_v21, %v501_v22 }
 0x11a   : > { %1216 = vrot.lane.b32.xlu0 %v2839_v5, %s2181_s6  ;;  %v3025_v23 = vpop.permute.xlu1 %547 }
 0x11b   : > { %3687 = vst [vmem:[#allocation33_spill] sm:$0xff] %v3025_v23 }
 0x11c   : > { %v3030_v3 = vpop.permute.xlu0 %545  ;;  %1231 = vrot.lane.b32.xlu1 %v2773_v41, %s2182_s7 }
 0x11d   : > { %3688 = vst [vmem:[#allocation34_spill] sm:$0xff] %v3030_v3 }
 0x11e   : > { %1229 = vrot.lane.b32.xlu0 %v2604_v26, %s2182_s7  ;;  %v761_v23 = vpop.permute.xlu1 %760  ;;  %v863_v26 = vsel %vm859_vm5, %v846_v20, %v2697_v10  ;;  %v895_v10 = vsel %vm893_vm7, %v878_v16, %v2752_v43  ;;  %v3689_v20 = vshll.u32 %v2983_v38, 16 }
 0x11f   : > { %v880_v13 = vsel %vm876_vm6, %v863_v26, %v2723_v47  ;;  %v912_v12 = vsel %vm910_vm8, %v895_v10, %v2797_v14  ;;  %v3690_v26 = vld [vmem:[#allocation15_spill] sm:$0xff] }
 0x120   : > { %v759_v3 = vpop.permute.xlu0 %758  ;;  %521 = vrot.lane.b32.xlu1 %v3037_v62, %s2180_s5  ;;  %v897_v18 = vsel %vm893_vm7, %v880_v13, %v2748_v56  ;;  %v929_v56 = vsel %vm927_vm9, %v912_v12, %v2879_v25  ;;  %v1237_v31 = vrot.slane %v3689_v20, 1  ;;  %v1320_v13 = vsel %vm791_vm1, %v3691_v1, %v3690_v26 }
 0x121   : > { %v914_v21 = vsel %vm910_vm8, %v897_v18, %v2795_v6  ;;  %v946_v43 = vsel %vm944_vm10, %v929_v56, %v2904_v2  ;;  %v3692_v18 = vld [vmem:[#allocation16_spill] sm:$0xff] }
 0x122   : > { %519 = vrot.lane.b32.xlu0 %v2871_v11, %s2180_s5  ;;  %v3063_v34 = vpop.permute.xlu1 %1268  ;;  %v931_v47 = vsel %vm927_vm9, %v914_v21, %v2877_v19  ;;  %v1318_v10 = vsel %vm791_vm1, %v2379_v45, %v3692_v18  ;;  %v1336_v21 = vsel %vm808_vm2, %v1320_v13, %v2823_v0  ;;  %s217_s5 = sadd.s32 %s1947_s30, %s1946_s29 }
 0x123   : > { %v948_v61 = vsel %vm944_vm10, %v931_v47, %v2902_v55  ;;  %v1334_v47 = vsel %vm808_vm2, %v1318_v10, %v2829_v28  ;;  %v1352_v56 = vsel %vm825_vm3, %v1336_v21, %v2886_v51  ;;  %v3694_v28 = vrot.slane %v2296_v39, 1  ;;  %v1987_v51 = vld [vmem:[%s2257_s27 + $0x1d0] sm:$0xff] }
 0x124   : > { %v3069_v42 = vpop.permute.xlu0 %1266  ;;  %534 = vrot.lane.b32.xlu1 %v2922_v48, %s2181_s6  ;;  %v965_v14 = vsel %vm961_vm11, %v948_v61, %v2932_v50  ;;  %v3693_v61 = vshrl.u32 %v2983_v38, 16  ;;  %v1350_v0 = vsel %vm825_vm3, %v1334_v47, %v2888_v36 }
 0x125   : > { %v982_v25 = vsel %vm978_vm12, %v965_v14, %v2975_v30  ;;  %v241_v14 = vld [vmem:[%s2257_s27 + $0x90] sm:$0xff] }
 0x126   : > { %532 = vrot.lane.b32.xlu0 %v2730_v52, %s2181_s6  ;;  %v3087_v6 = vpop.permute.xlu1 %570  ;;  %v963_v52 = vsel %vm961_vm11, %v946_v43, %v2934_v59  ;;  %v999_v2 = vsel %vm995_vm13, %v982_v25, %v744_v32  ;;  %v3161_v43 = vor.u32 %v1237_v31, %v3693_v61  ;;  %v1368_v25 = vsel %vm842_vm4, %v1352_v56, %v2910_v4 }
 0x127   : > { %v980_v55 = vsel %vm978_vm12, %v963_v52, %v2977_v60  ;;  %v1016_v49 = vsel %vm1012_vm14, %v999_v2, %v761_v23  ;;  %v242_v52 = vld [vmem:[%s2257_s27 + $0x98] sm:$0x3]  ;;  %v3695_v2 = vld [vmem:[#allocation23_spill] sm:$0xff]  ;;  %v261_v39 = vmax.f32 %v241_v14, 0.0  ;;  %v367_v31 = vmax.f32 %v1987_v51, 0.0 }
 0x128   : > { %v3093_v19 = vpop.permute.xlu0 %568  ;;  %747 = vrot.lane.b32.xlu1 %v2404_v58, %s2190_s22  ;;  %v997_v50 = vsel %vm995_vm13, %v980_v55, %v742_v54  ;;  %v1988_v55 = vld [vmem:[%s2257_s27 + $0x1d8] sm:$0x3] }
 0x129   : > { %v1014_v22 = vsel %vm1012_vm14, %v997_v50, %v759_v3  ;;  %v523_v3 = vrot.slane %v2981_v7, 1  ;;  %v1366_v50 = vsel %vm842_vm4, %v1350_v0, %v3695_v2  ;;  %v368_v26 = vmax.f32 %v1988_v55, 0.0 }
 0x12a   : > { %745 = vrot.lane.b32.xlu0 %v2312_v57, %s2190_s22  ;;  %v778_v59 = vpop.permute.xlu1 %777 }
 0x12b   : > { %v1033_v30 = vsel %vm1029_vm15, %v1016_v49, %v778_v59  ;;  %v3696_v49 = vld [vmem:[#allocation26_spill] sm:$0xff]  ;;  %v3208_v61 = vpack.c.bf16 %v368_v26, %v367_v31 }
 0x12c   : > { %v776_v37 = vpop.permute.xlu0 %775  ;;  %1235 = vrot.lane.b32.xlu1 %v2983_v38, %s2182_s7  ;;  %v1384_v59 = vsel %vm859_vm5, %v1368_v25, %v3696_v49 }
 0x12d   : > { %v1031_v24 = vsel %vm1029_vm15, %v1014_v22, %v776_v37  ;;  %v1400_v4 = vsel %vm876_vm6, %v1384_v59, %v2987_v46 }
 0x12e   : > { %v1989_v60 = vcombine.low %v1031_v24, %v1033_v30  ;;  %1233 = vrot.lane.b32.xlu0 %v2763_v40, %s2182_s7  ;;  %v3115_v57 = vpop.permute.xlu1 %1063  ;;  %v3697_v30 = vld [vmem:[#allocation27_spill] sm:$0xff]  ;;  %v262_v24 = vmax.f32 %v242_v52, 0.0  ;;  %v1416_v20 = vsel %vm893_vm7, %v1400_v4, %v3016_v35 }
 0x12f   : > { %v1382_v36 = vsel %vm859_vm5, %v1366_v50, %v3697_v30  ;;  %v1432_v46 = vsel %vm910_vm8, %v1416_v20, %v3063_v34  ;;  %v1259_v30 = vshll.u32 %v3208_v61, 16 }
 0x130   : > { %1714 = vmatmul.mubr.bf16.vlgmr.msra.gmra.mrb[0].mxu0 %v1989_v60  ;;  %v3117_v32 = vpop.permute.xlu0 %1061  ;;  %1249 = vrot.lane.b32.xlu1 %v2962_v33, %s2183_s8  ;;  %v1398_v60 = vsel %vm876_vm6, %v1382_v36, %v2989_v44  ;;  %v3206_v34 = vpack.c.bf16 %v262_v24, %v261_v39  ;;  %v3699_v36 = vld [vmem:[#allocation20_spill] sm:$0xff] }
 0x131   : > { %v1414_v13 = vsel %vm893_vm7, %v1398_v60, %v3018_v29 }
 0x132   : > { %1247 = vrot.lane.b32.xlu0 %v2769_v15, %s2183_s8  ;;  %v1286_v54 = vpop.permute.xlu1 %1285  ;;  %v697_v15 = vrot.slane %v2379_v45, 1  ;;  %v1430_v44 = vsel %vm910_vm8, %v1414_v13, %v3069_v42  ;;  %v3698_v42 = vld [vmem:[#allocation17_spill] sm:$0xff]  ;;  %v558_v31 = vshrl.u32 %v3206_v34, 16  ;;  %v3700_v13 = vld [vmem:[#allocation32_spill] sm:$0xff] }
 0x133   : > { %v1448_v18 = vsel %vm927_vm9, %v1432_v46, %v1286_v54 }
 0x134   : > { %v1284_v23 = vpop.permute.xlu0 %1283  ;;  %538 = vrot.lane.b32.xlu1 %v523_v3, %s2181_s6 }
 0x135   : > { %v1446_v10 = vsel %vm927_vm9, %v1430_v44, %v1284_v23 }
 0x136   : > { %536 = vrot.lane.b32.xlu0 %v2917_v63, %s2181_s6  ;;  %v3129_v17 = vpop.permute.xlu1 %587  ;;  %s1948_s6 = sshll.u32 %s217_s5, 3 }
 0x138   : > { %v3131_v27 = vpop.permute.xlu0 %585  ;;  %551 = vrot.lane.b32.xlu1 %v2807_v53, %s2182_s7 }
 0x13a   : > { %549 = vrot.lane.b32.xlu0 %v2817_v9, %s2182_s7  ;;  %v3143_v16 = vpop.permute.xlu1 %1067 }
 0x13c   : > { %v3150_v12 = vpop.permute.xlu0 %1065  ;;  %764 = vrot.lane.b32.xlu1 %v697_v15, %s2191_s24 }
 0x13e   : > { %762 = vrot.lane.b32.xlu0 %v3694_v28, %s2191_s24  ;;  %v3178_v22 = vpop.permute.xlu1 %1135 }
 0x140   : > { %v3184_v37 = vpop.permute.xlu0 %1133  ;;  %1253 = vrot.lane.b32.xlu1 %v3161_v43, %s2183_s8 }
 0x142   : > { %1251 = vrot.lane.b32.xlu0 %v2954_v8, %s2183_s8  ;;  %v1304_v35 = vpop.permute.xlu1 %1303 }
 0x143   : > { %v1464_v21 = vsel %vm944_vm10, %v1448_v18, %v1304_v35 }
 0x144   : > { %v1302_v47 = vpop.permute.xlu0 %1301  ;;  %v1493_v56 = vshll.u32 %v1464_v21, 16  ;;  %1272 = vrot.lane.b32.xlu1 %v2839_v5, %s2184_s9  ;;  %v1491_v54 = vshrl.u32 %v1464_v21, 16  ;;  %v1256_v5 = vshrl.u32 %v3208_v61, 16 }
 0x145   : > { %v1462_v29 = vsel %vm944_vm10, %v1446_v10, %v1302_v47 }
 0x146   : > { %v1487_v14 = vshll.u32 %v1462_v29, 16  ;;  %1270 = vrot.lane.b32.xlu0 %v3698_v42, %s2184_s9  ;;  %v1495_v52 = vrot.slane %v1493_v56, 1  ;;  %v3212_v23 = vpop.permute.xlu1 %445  ;;  %v1485_v0 = vshrl.u32 %v1462_v29, 16  ;;  %v1258_v59 = vrot.slane %v1256_v5, 7  ;;  %v3703_v42 = vld [vmem:[#allocation19_spill] sm:$0xff] }
 0x148   : > { %v1489_v25 = vrot.slane %v1487_v14, 1  ;;  %v3214_v28 = vpop.permute.xlu0 %443  ;;  %v1496_v51 = vor.u32 %v1495_v52, %v1491_v54  ;;  %555 = vrot.lane.b32.xlu1 %v3206_v34, %s2182_s7  ;;  %v1261_v24 = vor.u32 %v1259_v30, %v1258_v59  ;;  %v3702_v14 = vld [vmem:[#allocation3_spill] sm:$0xff]  ;;  %v3704_v54 = vld [vmem:[#allocation2_spill] sm:$0xff]  ;;  %v3705_v52 = vld [vmem:[#allocation21_spill] sm:$0xff] }
 0x149   : > { %v3708_v59 = vld [vmem:[#allocation25_spill] sm:$0xff] }
 0x14a   : > { %v1490_v55 = vor.u32 %v1489_v25, %v1485_v0  ;;  %553 = vrot.lane.b32.xlu0 %v2981_v7, %s2182_s7  ;;  %v3221_v2 = vpop.permute.xlu1 %611 }
 0x14c   : > { %v1992_v50 = vcombine.low %v1490_v55, %v1496_v51  ;;  %v3223_v49 = vpop.permute.xlu0 %609  ;;  %574 = vrot.lane.b32.xlu1 %v2871_v11, %s2183_s8  ;;  %v560_v11 = vshll.u32 %v3206_v34, 16  ;;  %v3706_v51 = vld [vmem:[#allocation22_spill] sm:$0xff] }
 0x14e   : > { %572 = vrot.lane.b32.xlu0 %v3699_v36, %s2183_s8  ;;  %2012 = vmatprep.mubr.msk.bf16.mxu0 %vm961_vm11, %v1992_v50  ;;  %v3233_v4 = vpop.permute.xlu1 %1139  ;;  %v562_v26 = vrot.slane %v560_v11, 1  ;;  %v3709_v36 = vld [vmem:[#allocation28_spill] sm:$0xff]  ;;  %v1295_v11 = vrot.slane %v1259_v30, 1 }
 0x150   : > { %v3235_v39 = vpop.permute.xlu0 %1137  ;;  %781 = vrot.lane.b32.xlu1 %v3691_v1, %s2192_s25  ;;  %v563_v18 = vor.u32 %v562_v26, %v558_v31  ;;  %v3710_v31 = vld [vmem:[#allocation29_spill] sm:$0xff] }
 0x152   : > { %779 = vrot.lane.b32.xlu0 %v2379_v45, %s2192_s25  ;;  %v3242_v60 = vpop.permute.xlu1 %1159 }
 0x154   : > { %v3244_v20 = vpop.permute.xlu0 %1157  ;;  %1276 = vrot.lane.b32.xlu1 %v1261_v24, %s2184_s9 }
 0x156   : > { %1274 = vrot.lane.b32.xlu0 %v3700_v13, %s2184_s9  ;;  %v3250_v46 = vpop.permute.xlu1 %449  ;;  %v3711_v13 = vld [vmem:[#allocation30_spill] sm:$0xff] }
 0x158   : > { %v3252_v44 = vpop.permute.xlu0 %447  ;;  %1289 = vrot.lane.b32.xlu1 %v2763_v40, %s2185_s10 }
 0x15a   : > { %1287 = vrot.lane.b32.xlu0 %v2773_v41, %s2185_s10  ;;  %v478_v35 = vpop.permute.xlu1 %477 }
 0x15c   : > { %v476_v10 = vpop.permute.xlu0 %475  ;;  %578 = vrot.lane.b32.xlu1 %v563_v18, %s2183_s8 }
 0x15e   : > { %576 = vrot.lane.b32.xlu0 %v3037_v62, %s2183_s8  ;;  %v684_v21 = vpop.permute.xlu1 %683  ;;  %v3701_v62 = vld [vmem:[#allocation18_spill] sm:$0xff] }
 0x160   : > { %v682_v47 = vpop.permute.xlu0 %681  ;;  %591 = vrot.lane.b32.xlu1 %v2917_v63, %s2184_s9  ;;  %v580_v63 = vrot.slane %v3206_v34, 1  ;;  %v3707_v34 = vld [vmem:[#allocation24_spill] sm:$0xff] }
 0x162   : > { %589 = vrot.lane.b32.xlu0 %v2922_v48, %s2184_s9  ;;  %v1164_v40 = vpop.permute.xlu1 %1163  ;;  %v799_v48 = vsel %vm791_vm1, %v3702_v14, %v3701_v62  ;;  %v3712_v62 = vld [vmem:[#allocation7_spill] sm:$0xff] }
 0x163   : > { %v816_v0 = vsel %vm808_vm2, %v799_v48, %v3705_v52  ;;  %v803_v14 = vsel %vm791_vm1, %v3712_v62, %v3212_v23  ;;  %v3713_v48 = vld [vmem:[#allocation31_spill] sm:$0xff] }
 0x164   : > { %v1162_v56 = vpop.permute.xlu0 %1161  ;;  %1293 = vrot.lane.b32.xlu1 %v3208_v61, %s2185_s10  ;;  %v833_v55 = vsel %vm825_vm3, %v816_v0, %v3707_v34  ;;  %v820_v52 = vsel %vm808_vm2, %v803_v14, %v478_v35 }
 0x165   : > { %v850_v24 = vsel %vm842_vm4, %v833_v55, %v3709_v36 }
 0x166   : > { %1291 = vrot.lane.b32.xlu0 %v2983_v38, %s2185_s10  ;;  %v3269_v41 = vpop.permute.xlu1 %1191  ;;  %v797_v38 = vsel %vm791_vm1, %v3704_v54, %v3703_v42  ;;  %v867_v18 = vsel %vm859_vm5, %v850_v24, %v3711_v13  ;;  %v3714_v54 = vld [vmem:[#allocation33_spill] sm:$0xff] }
 0x167   : > { %v884_v30 = vsel %vm876_vm6, %v867_v18, %v3714_v54 }
 0x168   : > { %v3271_v29 = vpop.permute.xlu0 %1189  ;;  %1307 = vrot.lane.b32.xlu1 %v2954_v8, %s2186_s11  ;;  %v814_v8 = vsel %vm808_vm2, %v797_v38, %v3706_v51  ;;  %v3716_v51 = vld [vmem:[#allocation34_spill] sm:$0xff]  ;;  %v901_v7 = vsel %vm893_vm7, %v884_v30, %v3087_v6  ;;  %v807_v30 = vsel %vm791_vm1, %v2807_v53, %v3250_v46  ;;  %v3723_v46 = vld [vmem:[#allocation12_spill] sm:$0xff] }
 0x169   : > { %v3722_v53 = vld [vmem:[#allocation10_spill] sm:$0xff] }
 0x16a   : > { %1305 = vrot.lane.b32.xlu0 %v2962_v33, %s2186_s11  ;;  %v3286_v25 = vpop.permute.xlu1 %481  ;;  %v831_v33 = vsel %vm825_vm3, %v814_v8, %v3708_v59  ;;  %v1296_v59 = vor.u32 %v1295_v11, %v1256_v5 }
 0x16b   : > { %v848_v26 = vsel %vm842_vm4, %v831_v33, %v3710_v31 }
 0x16c   : > { %v3292_v50 = vpop.permute.xlu0 %479  ;;  %595 = vrot.lane.b32.xlu1 %v580_v63, %s2184_s9  ;;  %v865_v42 = vsel %vm859_vm5, %v848_v26, %v3713_v48  ;;  %v3715_v63 = vld [vmem:[#allocation6_spill] sm:$0xff]  ;;  %v3719_v26 = vld [vmem:[#allocation8_spill] sm:$0xff] }
 0x16d   : > { %v801_v38 = vsel %vm791_vm1, %v3715_v63, %v3214_v28  ;;  %v882_v23 = vsel %vm876_vm6, %v865_v42, %v3716_v51  ;;  %v918_v28 = vsel %vm910_vm8, %v901_v7, %v3129_v17  ;;  %v1324_v13 = vsel %vm791_vm1, %v3719_v26, %v3115_v57 }
 0x16e   : > { %593 = vrot.lane.b32.xlu0 %v523_v3, %s2184_s9  ;;  %v495_v0 = vpop.permute.xlu1 %494  ;;  %v818_v3 = vsel %vm808_vm2, %v801_v38, %v476_v10  ;;  %v899_v55 = vsel %vm893_vm7, %v882_v23, %v3093_v19  ;;  %v935_v10 = vsel %vm927_vm9, %v918_v28, %v3221_v2 }
 0x16f   : > { %v837_v8 = vsel %vm825_vm3, %v820_v52, %v495_v0  ;;  %v916_v6 = vsel %vm910_vm8, %v899_v55, %v3131_v27  ;;  %v952_v17 = vsel %vm944_vm10, %v935_v10, %v684_v21  ;;  %v3717_v27 = vld [vmem:[#allocation11_spill] sm:$0xff] }
 0x170   : > { %v493_v34 = vpop.permute.xlu0 %492  ;;  %615 = vrot.lane.b32.xlu1 %v3691_v1, %s2185_s10  ;;  %v933_v19 = vsel %vm927_vm9, %v916_v6, %v3223_v49  ;;  %v1328_v24 = vsel %vm791_vm1, %v3717_v27, %v3143_v16  ;;  %v3718_v49 = vld [vmem:[#allocation13_spill] sm:$0xff] }
 0x171   : > { %v835_v35 = vsel %vm825_vm3, %v818_v3, %v493_v34  ;;  %v950_v36 = vsel %vm944_vm10, %v933_v19, %v682_v47  ;;  %v1326_v21 = vsel %vm791_vm1, %v3718_v49, %v3150_v12  ;;  %v1344_v47 = vsel %vm808_vm2, %v1328_v24, %v3233_v4  ;;  %v3720_v4 = vld [vmem:[#allocation9_spill] sm:$0xff]  ;;  %v3724_v24 = vld [vmem:[#allocation14_spill] sm:$0xff] }
 0x172   : > { %613 = vrot.lane.b32.xlu0 %v2379_v45, %s2185_s10  ;;  %v708_v33 = vpop.permute.xlu1 %707  ;;  %v1342_v11 = vsel %vm808_vm2, %v1326_v21, %v3235_v39  ;;  %v1360_v16 = vsel %vm825_vm3, %v1344_v47, %v1164_v40  ;;  %v1322_v14 = vsel %vm791_vm1, %v3720_v4, %v3117_v32  ;;  %v699_v23 = vrot.slane %v3720_v4, 1 }
 0x173   : > { %v3343_v61 = vsel %vm961_vm11, %v952_v17, %v708_v33  ;;  %v1358_v18 = vsel %vm825_vm3, %v1342_v11, %v1162_v56  ;;  %v1338_v57 = vsel %vm808_vm2, %v1322_v14, %v3184_v37  ;;  %v757_v11 = vrot.slane %v3718_v49, 1 }
 0x174   : > { %v706_v5 = vpop.permute.xlu0 %705  ;;  %1311 = vrot.lane.b32.xlu1 %v1296_v59, %s2186_s11  ;;  %v1354_v32 = vsel %vm825_vm3, %v1338_v57, %v3244_v20  ;;  %v805_v20 = vsel %vm791_vm1, %v2817_v9, %v3252_v44 }
 0x175   : > { %v3349_v2 = vsel %vm961_vm11, %v950_v36, %v706_v5  ;;  %v1370_v48 = vsel %vm842_vm4, %v1354_v32, %v3271_v29  ;;  %v822_v63 = vsel %vm808_vm2, %v805_v20, %v3292_v50  ;;  %v700_v50 = vrot.slane %v3719_v26, 1 }
 0x176   : > { %1309 = vrot.lane.b32.xlu0 %v3161_v43, %s2186_s11  ;;  %v1196_v31 = vpop.permute.xlu1 %1195  ;;  %v1340_v43 = vsel %vm808_vm2, %v1324_v13, %v3178_v22 }
 0x177   : > { %v1376_v12 = vsel %vm842_vm4, %v1360_v16, %v1196_v31  ;;  %v1356_v40 = vsel %vm825_vm3, %v1340_v43, %v3242_v60  ;;  %v3721_v60 = vld [vmem:[#allocation5_spill] sm:$0xff] }
 0x178   : > { %v1194_v62 = vpop.permute.xlu0 %1193  ;;  %619 = vrot.lane.b32.xlu1 %v3719_v26, %s2185_s10  ;;  %v1372_v22 = vsel %vm842_vm4, %v1356_v40, %v3269_v41  ;;  %v824_v41 = vsel %vm808_vm2, %v807_v30, %v3286_v25 }
 0x179   : > { %v1374_v39 = vsel %vm842_vm4, %v1358_v18, %v1194_v62 }
 0x17a   : > { %617 = vrot.lane.b32.xlu0 %v3720_v4, %s2185_s10  ;;  %v1215_v56 = vpop.permute.xlu1 %1214 }
 0x17b   : > { %v1388_v42 = vsel %vm859_vm5, %v1372_v22, %v1215_v56 }
 0x17c   : > { %v1213_v54 = vpop.permute.xlu0 %1212  ;;  %687 = vrot.lane.b32.xlu1 %v3721_v60, %s2186_s11 }
 0x17d   : > { %v1386_v37 = vsel %vm859_vm5, %v1370_v48, %v1213_v54 }
 0x17e   : > { %685 = vrot.lane.b32.xlu0 %v2404_v58, %s2186_s11  ;;  %v499_v29 = vpop.permute.xlu1 %498  ;;  %v698_v58 = vrot.slane %v3691_v1, 1 }
 0x17f   : > { %v841_v38 = vsel %vm825_vm3, %v824_v41, %v499_v29 }
 0x180   : > { %v497_v52 = vpop.permute.xlu0 %496  ;;  %691 = vrot.lane.b32.xlu1 %v3722_v53, %s2186_s11 }
 0x181   : > { %v839_v0 = vsel %vm825_vm3, %v822_v63, %v497_v52 }
 0x182   : > { %689 = vrot.lane.b32.xlu0 %v3723_v46, %s2186_s11  ;;  %v518_v9 = vpop.permute.xlu1 %517  ;;  %s219_s11 = scalar_lea.vmem %s3616_s4, %s1948_s6 }
 0x183   : > { %v854_v44 = vsel %vm842_vm4, %v837_v8, %v518_v9 }
 0x184   : > { %v516_v25 = vpop.permute.xlu0 %515  ;;  %711 = vrot.lane.b32.xlu1 %v698_v58, %s2188_s14 }
 0x185   : > { %v852_v51 = vsel %vm842_vm4, %v835_v35, %v516_v25 }
 0x186   : > { %709 = vrot.lane.b32.xlu0 %v697_v15, %s2188_s14  ;;  %v3418_v7 = vpop.permute.xlu1 %724 }
 0x187   : > { %v986_v63 = vsel %vm978_vm12, %v3343_v61, %v3418_v7 }
 0x188   : > { %v3420_v3 = vpop.permute.xlu0 %722  ;;  %715 = vrot.lane.b32.xlu1 %v700_v50, %s2188_s14 }
 0x189   : > { %v984_v52 = vsel %vm978_vm12, %v3349_v2, %v3420_v3 }
 0x18a   : > { %713 = vrot.lane.b32.xlu0 %v699_v23, %s2188_s14  ;;  %v1219_v8 = vpop.permute.xlu1 %1218 }
 0x18b   : > { %v1392_v34 = vsel %vm859_vm5, %v1376_v12, %v1219_v8 }
 0x18c   : > { %v1217_v55 = vpop.permute.xlu0 %1216  ;;  %728 = vrot.lane.b32.xlu1 %v3720_v4, %s2189_s13 }
 0x18d   : > { %v1390_v28 = vsel %vm859_vm5, %v1374_v39, %v1217_v55 }
 0x18e   : > { %726 = vrot.lane.b32.xlu0 %v3691_v1, %s2189_s13  ;;  %v1232_v45 = vpop.permute.xlu1 %1231 }
 0x18f   : > { %v3431_v15 = vsel %vm876_vm6, %v1388_v42, %v1232_v45 }
 0x190   : > { %v1230_v35 = vpop.permute.xlu0 %1229  ;;  %732 = vrot.lane.b32.xlu1 %v3718_v49, %s2189_s13 }
 0x191   : > { %v3434_v59 = vsel %vm876_vm6, %v1386_v37, %v1230_v35 }
 0x192   : > { %730 = vrot.lane.b32.xlu0 %v3719_v26, %s2189_s13  ;;  %v522_v6 = vpop.permute.xlu1 %521 }
 0x193   : > { %v858_v10 = vsel %vm842_vm4, %v841_v38, %v522_v6 }
 0x194   : > { %v520_v19 = vpop.permute.xlu0 %519  ;;  %751 = vrot.lane.b32.xlu1 %v3723_v46, %s2190_s22 }
 0x195   : > { %v856_v1 = vsel %vm842_vm4, %v839_v0, %v520_v19 }
 0x196   : > { %749 = vrot.lane.b32.xlu0 %v3721_v60, %s2190_s22  ;;  %v535_v17 = vpop.permute.xlu1 %534 }
 0x197   : > { %v871_v33 = vsel %vm859_vm5, %v854_v44, %v535_v17 }
 0x198   : > { %v533_v36 = vpop.permute.xlu0 %532  ;;  %755 = vrot.lane.b32.xlu1 %v3724_v24, %s2190_s22 }
 0x199   : > { %v869_v5 = vsel %vm859_vm5, %v852_v51, %v533_v36 }
 0x19a   : > { %753 = vrot.lane.b32.xlu0 %v3722_v53, %s2190_s22  ;;  %v748_v21 = vpop.permute.xlu1 %747 }
 0x19b   : > { %v1003_v0 = vsel %vm995_vm13, %v986_v63, %v748_v21 }
 0x19c   : > { %v746_v47 = vpop.permute.xlu0 %745  ;;  %768 = vrot.lane.b32.xlu1 %v699_v23, %s2191_s24 }
 0x19d   : > { %v1001_v53 = vsel %vm995_vm13, %v984_v52, %v746_v47 }
 0x19e   : > { %766 = vrot.lane.b32.xlu0 %v698_v58, %s2191_s24  ;;  %v1236_v16 = vpop.permute.xlu1 %1235 }
 0x19f   : > { %v3456_v31 = vsel %vm876_vm6, %v1392_v34, %v1236_v16 }
 0x1a0   : > { %v1234_v13 = vpop.permute.xlu0 %1233  ;;  %772 = vrot.lane.b32.xlu1 %v757_v11, %s2191_s24 }
 0x1a1   : > { %v3459_v18 = vsel %vm876_vm6, %v1390_v28, %v1234_v13 }
 0x1a2   : > { %770 = vrot.lane.b32.xlu0 %v700_v50, %s2191_s24  ;;  %v1250_v12 = vpop.permute.xlu1 %1249 }
 0x1a4   : > { %v1248_v62 = vpop.permute.xlu0 %1247  ;;  %785 = vrot.lane.b32.xlu1 %v3719_v26, %s2192_s25 }
 0x1a5   : > { %v1418_v19 = vsel %vm893_vm7, %v3434_v59, %v1248_v62 }
 0x1a6   : > { %783 = vrot.lane.b32.xlu0 %v3720_v4, %s2192_s25  ;;  %v539_v14 = vpop.permute.xlu1 %538 }
 0x1a7   : > { %v875_v43 = vsel %vm859_vm5, %v858_v10, %v539_v14  ;;  %v1420_v10 = vsel %vm893_vm7, %v3431_v15, %v1250_v12 }
 0x1a8   : > { %v537_v39 = vpop.permute.xlu0 %536  ;;  %789 = vrot.lane.b32.xlu1 %v3717_v27, %s2192_s25 }
 0x1a9   : > { %v873_v57 = vsel %vm859_vm5, %v856_v1, %v537_v39 }
 0x1aa   : > { %787 = vrot.lane.b32.xlu0 %v3718_v49, %s2192_s25  ;;  %v552_v40 = vpop.permute.xlu1 %551 }
 0x1ab   : > { %v888_v32 = vsel %vm876_vm6, %v871_v33, %v552_v40 }
 0x1ac   : > { %v550_v22 = vpop.permute.xlu0 %549 }
 0x1ad   : > { %v886_v26 = vsel %vm876_vm6, %v869_v5, %v550_v22 }
 0x1ae   : > { %v765_v56 = vpop.permute.xlu1 %764 }
 0x1af   : > { %v1020_v58 = vsel %vm1012_vm14, %v1003_v0, %v765_v56 }
 0x1b0   : > { %v763_v4 = vpop.permute.xlu0 %762 }
 0x1b1   : > { %v1018_v9 = vsel %vm1012_vm14, %v1001_v53, %v763_v4 }
 0x1b2   : > { %v1254_v48 = vpop.permute.xlu1 %1253 }
 0x1b3   : > { %v1424_v22 = vsel %vm893_vm7, %v3456_v31, %v1254_v48 }
 0x1b4   : > { %v1252_v42 = vpop.permute.xlu0 %1251 }
 0x1b6   : > { %v1273_v54 = vpop.permute.xlu1 %1272 }
 0x1b7   : > { %v1436_v1 = vsel %vm910_vm8, %v1420_v10, %v1273_v54 }
 0x1b8   : > { %v1271_v37 = vpop.permute.xlu0 %1270 }
 0x1b9   : > { %v1434_v17 = vsel %vm910_vm8, %v1418_v19, %v1271_v37 }
 0x1ba   : > { %v556_v60 = vpop.permute.xlu1 %555 }
 0x1bb   : > { %v892_v30 = vsel %vm876_vm6, %v875_v43, %v556_v60 }
 0x1bc   : > { %v554_v20 = vpop.permute.xlu0 %553 }
 0x1bd   : > { %v890_v27 = vsel %vm876_vm6, %v873_v57, %v554_v20 }
 0x1be   : > { %v575_v41 = vpop.permute.xlu1 %574 }
 0x1bf   : > { %v3478_v49 = vsel %vm893_vm7, %v888_v32, %v575_v41 }
 0x1c0   : > { %v573_v29 = vpop.permute.xlu0 %572 }
 0x1c1   : > { %v3484_v38 = vsel %vm893_vm7, %v886_v26, %v573_v29  ;;  %v1422_v26 = vsel %vm893_vm7, %v3459_v18, %v1252_v42 }
 0x1c2   : > { %v782_v46 = vpop.permute.xlu1 %781 }
 0x1c3   : > { %v1037_v44 = vsel %vm1029_vm15, %v1020_v58, %v782_v46 }
 0x1c4   : > { %v780_v25 = vpop.permute.xlu0 %779 }
 0x1c5   : > { %v1035_v61 = vsel %vm1029_vm15, %v1018_v9, %v780_v25 }
 0x1c6   : > { %v1991_v51 = vcombine.low %v1035_v61, %v1037_v44  ;;  %v1277_v50 = vpop.permute.xlu1 %1276 }
 0x1c7   : > { %v1440_v56 = vsel %vm910_vm8, %v1424_v22, %v1277_v50 }
 0x1c8   : > { %1722 = vmatmul.mubr.bf16.gmra.mrb[4].mxu0 %v1991_v51  ;;  %v1275_v23 = vpop.permute.xlu0 %1274 }
 0x1c9   : > { %v1438_v4 = vsel %vm910_vm8, %v1422_v26, %v1275_v23 }
 0x1ca   : > { %v1290_v7 = vpop.permute.xlu1 %1289 }
 0x1cb   : > { %v1452_v33 = vsel %vm927_vm9, %v1436_v1, %v1290_v7 }
 0x1cc   : > { %v1288_v2 = vpop.permute.xlu0 %1287 }
 0x1cd   : > { %v1450_v5 = vsel %vm927_vm9, %v1434_v17, %v1288_v2 }
 0x1ce   : > { %v579_v3 = vpop.permute.xlu1 %578 }
 0x1cf   : > { %v3496_v8 = vsel %vm893_vm7, %v892_v30, %v579_v3 }
 0x1d0   : > { %v577_v34 = vpop.permute.xlu0 %576 }
 0x1d1   : > { %v3499_v55 = vsel %vm893_vm7, %v890_v27, %v577_v34 }
 0x1d2   : > { %v3501_v28 = vpop.permute.xlu1 %591 }
 0x1d4   : > { %v3503_v45 = vpop.permute.xlu0 %589 }
 0x1d6   : > { %v1294_v35 = vpop.permute.xlu1 %1293 }
 0x1d7   : > { %v1456_v54 = vsel %vm927_vm9, %v1440_v56, %v1294_v35 }
 0x1d8   : > { %v1292_v6 = vpop.permute.xlu0 %1291 }
 0x1d9   : > { %v1454_v60 = vsel %vm927_vm9, %v1438_v4, %v1292_v6 }
 0x1da   : > { %v1308_v36 = vpop.permute.xlu1 %1307 }
 0x1db   : > { %v1468_v24 = vsel %vm944_vm10, %v1452_v33, %v1308_v36 }
 0x1dc   : > { %v1306_v21 = vpop.permute.xlu0 %1305  ;;  %v1505_v47 = vshll.u32 %v1468_v24, 16  ;;  %v1503_v15 = vshrl.u32 %v1468_v24, 16 }
 0x1dd   : > { %v1466_v11 = vsel %vm944_vm10, %v1450_v5, %v1306_v21 }
 0x1de   : > { %v1499_v16 = vshll.u32 %v1466_v11, 16  ;;  %v1507_v13 = vrot.slane %v1505_v47, 1  ;;  %v3515_v12 = vpop.permute.xlu1 %595  ;;  %v1497_v59 = vshrl.u32 %v1466_v11, 16  ;;  %v922_v47 = vsel %vm910_vm8, %v3478_v49, %v3501_v28 }
 0x1df   : > { %v920_v11 = vsel %vm910_vm8, %v3484_v38, %v3503_v45  ;;  %v926_v49 = vsel %vm910_vm8, %v3496_v8, %v3515_v12 }
 0x1e0   : > { %v1501_v62 = vrot.slane %v1499_v16, 1  ;;  %v3517_v14 = vpop.permute.xlu0 %593  ;;  %v1508_v43 = vor.u32 %v1507_v13, %v1503_v15 }
 0x1e1   : > { %v924_v45 = vsel %vm910_vm8, %v3499_v55, %v3517_v14 }
 0x1e2   : > { %v1502_v39 = vor.u32 %v1501_v62, %v1497_v59  ;;  %v616_v57 = vpop.permute.xlu1 %615 }
 0x1e3   : > { %v939_v16 = vsel %vm927_vm9, %v922_v47, %v616_v57 }
 0x1e4   : > { %v1994_v40 = vcombine.low %v1502_v39, %v1508_v43  ;;  %v614_v32 = vpop.permute.xlu0 %613 }
 0x1e5   : > { %v937_v15 = vsel %vm927_vm9, %v920_v11, %v614_v32 }
 0x1e6   : > { %2013 = vmatprep.mubr.msk.bf16.mxu0 %vm961_vm11, %v1994_v40  ;;  %v1312_v37 = vpop.permute.xlu1 %1311 }
 0x1e7   : > { %v1472_v30 = vsel %vm944_vm10, %v1456_v54, %v1312_v37 }
 0x1e8   : > { %v1310_v20 = vpop.permute.xlu0 %1309  ;;  %v1517_v27 = vshll.u32 %v1472_v30, 16  ;;  %v1515_v41 = vshrl.u32 %v1472_v30, 16 }
 0x1e9   : > { %v1470_v31 = vsel %vm944_vm10, %v1454_v60, %v1310_v20 }
 0x1ea   : > { %v1511_v48 = vshll.u32 %v1470_v31, 16  ;;  %v1519_v18 = vrot.slane %v1517_v27, 1  ;;  %v620_v42 = vpop.permute.xlu1 %619  ;;  %v1509_v29 = vshrl.u32 %v1470_v31, 16 }
 0x1eb   : > { %v943_v57 = vsel %vm927_vm9, %v926_v49, %v620_v42 }
 0x1ec   : > { %v1513_v63 = vrot.slane %v1511_v48, 1  ;;  %v618_v52 = vpop.permute.xlu0 %617  ;;  %v1520_v0 = vor.u32 %v1519_v18, %v1515_v41 }
 0x1ed   : > { %v941_v22 = vsel %vm927_vm9, %v924_v45, %v618_v52 }
 0x1ee   : > { %v1514_v53 = vor.u32 %v1513_v63, %v1509_v29  ;;  %v688_v58 = vpop.permute.xlu1 %687  ;;  %v1750_v29 = vld [vmem:[%s3614_s2] sm:$0xf] }
 0x1ef   : > { %v956_v13 = vsel %vm944_vm10, %v939_v16, %v688_v58  ;;  %2065 = vmatprep.subr.msk.bf16.mxu1 %vm1677_vm0, %v1750_v29 }
 0x1f0   : > { %v686_v46 = vpop.permute.xlu0 %685  ;;  %v1996_v9 = vcombine.low %v1514_v53, %v1520_v0 }
 0x1f1   : > { %v954_v62 = vsel %vm944_vm10, %v937_v15, %v686_v46  ;;  %v1771_v46 = vsel %vm1677_vm0, %v1750_v29, 0 }
 0x1f2   : > { %2014 = vmatprep.mubr.msk.bf16.mxu1 %vm961_vm11, %v1996_v9  ;;  %v692_v44 = vpop.permute.xlu1 %691 }
 0x1f3   : > { %v960_v26 = vsel %vm944_vm10, %v943_v57, %v692_v44 }
 0x1f4   : > { %v690_v25 = vpop.permute.xlu0 %689 }
 0x1f5   : > { %v958_v4 = vsel %vm944_vm10, %v941_v22, %v690_v25 }
 0x1f6   : > { %v712_v61 = vpop.permute.xlu1 %711 }
 0x1f7   : > { %v973_v43 = vsel %vm961_vm11, %v956_v13, %v712_v61 }
 0x1f8   : > { %v710_v51 = vpop.permute.xlu0 %709 }
 0x1f9   : > { %v971_v28 = vsel %vm961_vm11, %v954_v62, %v710_v51 }
 0x1fa   : > { %v716_v50 = vpop.permute.xlu1 %715 }
 0x1fb   : > { %v977_v54 = vsel %vm961_vm11, %v960_v26, %v716_v50 }
 0x1fc   : > { %v714_v23 = vpop.permute.xlu0 %713 }
 0x1fd   : > { %v975_v60 = vsel %vm961_vm11, %v958_v4, %v714_v23 }
 0x1fe   : > { %v729_v7 = vpop.permute.xlu1 %728 }
 0x1ff   : > { %v990_v38 = vsel %vm978_vm12, %v973_v43, %v729_v7 }
 0x200   : > { %v727_v2 = vpop.permute.xlu0 %726 }
 0x201   : > { %v988_v40 = vsel %vm978_vm12, %v971_v28, %v727_v2 }
 0x202   : > { %v733_v34 = vpop.permute.xlu1 %732 }
 0x203   : > { %v1715_v3 = vpop.f32.mrb[0].mxu0  ;;  %v994_v30 = vsel %vm978_vm12, %v977_v54, %v733_v34 }
 0x204   : > { %v1717_v35 = vpop.f32.mrb[1].mxu0  ;;  %v731_v6 = vpop.permute.xlu0 %730 }
 0x205   : > { %v1718_v10 = vpop.f32.mrb[2].mxu0  ;;  %v992_v27 = vsel %vm978_vm12, %v975_v60, %v731_v6 }
 0x206   : > { %v1746_v19 = vpack.c.bf16 %v1718_v10, %v1715_v3  ;;  %v1720_v1 = vpop.f32.mrb[3].mxu0  ;;  %v752_v17 = vpop.permute.xlu1 %751 }
 0x207   : > { %v1007_v32 = vsel %vm995_vm13, %v990_v38, %v752_v17  ;;  %v2015_v1 = vld [vmem:[%s3615_s3] ss:$0 sm:$0xff] }
 0x208   : > { %v750_v33 = vpop.permute.xlu0 %749 }
 0x209   : > { %v1005_v8 = vsel %vm995_vm13, %v988_v40, %v750_v33 }
 0x20a   : > { %v756_v36 = vpop.permute.xlu1 %755 }
 0x20b   : > { %v1011_v31 = vsel %vm995_vm13, %v994_v30, %v756_v36 }
 0x20c   : > { %v754_v5 = vpop.permute.xlu0 %753 }
 0x20d   : > { %v1009_v41 = vsel %vm995_vm13, %v992_v27, %v754_v5 }
 0x20e   : > { %v769_v24 = vpop.permute.xlu1 %768 }
 0x20f   : > { %v1024_v12 = vsel %vm1012_vm14, %v1007_v32, %v769_v24 }
 0x210   : > { %v767_v21 = vpop.permute.xlu0 %766 }
 0x211   : > { %v1022_v55 = vsel %vm1012_vm14, %v1005_v8, %v767_v21 }
 0x212   : > { %v773_v59 = vpop.permute.xlu1 %772 }
 0x213   : > { %v1028_v18 = vsel %vm1012_vm14, %v1011_v31, %v773_v59 }
 0x214   : > { %v771_v39 = vpop.permute.xlu0 %770 }
 0x215   : > { %v1026_v63 = vsel %vm1012_vm14, %v1009_v41, %v771_v39 }
 0x216   : > { %v786_v56 = vpop.permute.xlu1 %785 }
 0x217   : > { %v1041_v14 = vsel %vm1029_vm15, %v1024_v12, %v786_v56 }
 0x218   : > { %v784_v37 = vpop.permute.xlu0 %783 }
 0x219   : > { %v1039_v20 = vsel %vm1029_vm15, %v1022_v55, %v784_v37 }
 0x21a   : > { %v1993_v48 = vcombine.low %v1039_v20, %v1041_v14  ;;  %v790_v42 = vpop.permute.xlu1 %789 }
 0x21b   : > { %v1045_v52 = vsel %vm1029_vm15, %v1028_v18, %v790_v42 }
 0x21c   : > { %1730 = vmatmul.mubr.bf16.gmra.mrb[8].mxu0 %v1993_v48  ;;  %v788_v0 = vpop.permute.xlu0 %787 }
 0x21d   : > { %v1043_v53 = vsel %vm1029_vm15, %v1026_v63, %v788_v0 }
 0x21e   : > { %v1995_v58 = vcombine.low %v1043_v53, %v1045_v52 }
 0x220   : > { %1738 = vmatmul.mubr.bf16.vlgmr.msra.gmra.mrb[0].mxu1 %v1995_v58 }
 0x221   : > { %2029 = vmatprep.mubr.msk.bf16.mxu1 %vm791_vm1, %v1746_v19  ;;  %2028 = vmatpush3.bf16.msra.mxu1 %v1771_v46 }
 0x29b   : > { %v1723_v9 = vpop.f32.mrb[4].mxu0 }
 0x29c   : > { %v1725_v44 = vpop.f32.mrb[5].mxu0 }
 0x29d   : > { %v1726_v25 = vpop.f32.mrb[6].mxu0 }
 0x29e   : > { %v1747_v61 = vpack.c.bf16 %v1726_v25, %v1723_v9  ;;  %v1728_v51 = vpop.f32.mrb[7].mxu0 }
 0x2a0   : > { %2030 = vmatmul.mubr.msk.bf16.vlgmr.msra.gmra.mrb[4].mxu1 %vm791_vm1, %v1747_v61 }
 0x2ef   : > { %v1731_v50 = vpop.f32.mrb[8].mxu0 }
 0x2f0   : > { %v1733_v23 = vpop.f32.mrb[9].mxu0 }
 0x2f1   : > { %v1734_v7 = vpop.f32.mrb[10].mxu0 }
 0x2f2   : > { %v1748_v2 = vpack.c.bf16 %v1734_v7, %v1731_v50  ;;  %v1736_v3 = vpop.f32.mrb[11].mxu0 }
 0x2f3   : > { %v1739_v34 = vpop.f32.mrb[0].mxu1 }
 0x2f4   : > { %v1741_v35 = vpop.f32.mrb[1].mxu1  ;;  %2033 = vmatprep.mubr.msk.bf16.mxu1 %vm791_vm1, %v1748_v2 }
 0x2f5   : > { %v1742_v6 = vpop.f32.mrb[2].mxu1 }
 0x2f6   : > { %v1749_v10 = vpack.c.bf16 %v1742_v6, %v1739_v34  ;;  %v1744_v19 = vpop.f32.mrb[3].mxu1 }
 0x2f8   : > { %2034 = vmatmul.mubr.msk.bf16.gmra.mrb[8].mxu1 %vm791_vm1, %v1749_v10 }
 0x373   : > { %v2031_v17 = vpop.f32.mrb[4].mxu1 }
 0x374   : > { %v1816_v33 = vadd.f32 %v2031_v17, %v2015_v1  ;;  %v1807_v36 = vpop.f32.mrb[5].mxu1 }
 0x375   : > { %v1808_v5 = vadd.f32 %v2015_v1, %v1807_v36  ;;  %v2032_v24 = vpop.f32.mrb[6].mxu1 }
 0x376   : > { %1840 = vst.msk [vmem:[%s219_s11 + $0x10] sm:$0xff] %vm808_vm2, %v1816_v33  ;;  %v1819_v21 = vadd.f32 %v2032_v24, %v2015_v1  ;;  %v1810_v47 = vpop.f32.mrb[7].mxu1 }
 0x377   : > { %1838 = vst.msk [vmem:[%s219_s11] sm:$0xff] %vm808_vm2, %v1808_v5  ;;  %v1811_v11 = vadd.f32 %v2015_v1, %v1810_v47 }
 0x378   : > { %1841 = vst.msk [vmem:[%s219_s11 + $0x18] sm:$0xff] %vm808_vm2, %v1819_v21 }
 0x379   : > { %1839 = vst.msk [vmem:[%s219_s11 + $0x8] sm:$0xff] %vm808_vm2, %v1811_v11 }
 0x3cb   : > { %v2035_v16 = vpop.f32.mrb[8].mxu1 }
 0x3cc   : > { %v1832_v15 = vadd.f32 %v2035_v16, %v2015_v1  ;;  %v1823_v13 = vpop.f32.mrb[9].mxu1 }
 0x3cd   : > { %v1824_v59 = vadd.f32 %v2015_v1, %v1823_v13  ;;  %v2036_v62 = vpop.f32.mrb[10].mxu1 }
 0x3ce   : > { %1844 = vst.msk [vmem:[%s219_s11 + $0x30] sm:$0xff] %vm808_vm2, %v1832_v15  ;;  %v1835_v43 = vadd.f32 %v2036_v62, %v2015_v1  ;;  %v1826_v39 = vpop.f32.mrb[11].mxu1 }
 0x3cf   : > { %1842 = vst.msk [vmem:[%s219_s11 + $0x20] sm:$0xff] %vm808_vm2, %v1824_v59  ;;  %v1827_v49 = vadd.f32 %v2015_v1, %v1826_v39 }
 0x3d0   : > { %1845 = vst.msk [vmem:[%s219_s11 + $0x38] sm:$0xff] %vm808_vm2, %v1835_v43 }
 0x3d1   : > { %1843 = vst.msk [vmem:[%s219_s11 + $0x28] sm:$0xff] %vm808_vm2, %v1827_v49 }
 0x3d2 PF: > { %s14_s19 = sadd.s32 1, %s2175_s19   ;;  %s3725_s15 = smov %s2167_s17 }
 0x3d3   : > { %p11_p7 = scmp.ge.s32.totalorder %s14_s19, 18   ;;  %s3726_s16 = smov %s2171_s18 }
 0x3d4   : > { %s3727_s17 = smov %s3730_s20  ;;  %s3728_s18 = smov %s3734_s21 }
 0x3d5   :  { %13 = sbr.rel (!%p11_p7) target bundleno = 3 (0x3), region = 69 }

</bundles_post_ra>
